<compile_context>
chip_gen: v7x
topology: tpu7x:2x2x1
jax: 0.10.0
libtpu: 0.0.40
codegen_flags: <defaults>
</compile_context>

<pallas_src>
import jax
import jax.numpy as jnp
from jax.experimental import pallas as pl
from jax.experimental.pallas import tpu as pltpu


def _mlp_kernel(code_ref, desc_ref,
                w1c_ref, b1c_ref,
                w1d_ref, b1d_ref,
                w2c_ref, w2d_ref, b2_ref,
                w3_ref, b3_ref,
                w4_ref, b4_ref,
                out_ref):
    # Activations arrive at their HBM dtype (f32 here); cast in-kernel so the
    # wrapper never runs a separate HBM cast pass.
    code = code_ref[...].astype(jnp.bfloat16)            # (tm, 768)
    desc = desc_ref[...].astype(jnp.bfloat16)            # (tm, 768)

    # fc1_code / fc1_desc + ReLU (bf16 MXU matmul, f32 accumulate + epilogue)
    h_code = jnp.dot(code, w1c_ref[...], preferred_element_type=jnp.float32)
    h_code = jnp.maximum(h_code + b1c_ref[...], 0.0)
    h_desc = jnp.dot(desc, w1d_ref[...], preferred_element_type=jnp.float32)
    h_desc = jnp.maximum(h_desc + b1d_ref[...], 0.0)

    # concat([h_code, h_desc]) @ W2 == h_code @ W2[:256] + h_desc @ W2[256:]
    # (W2 is pre-split in the wrapper -> no in-kernel slicing / copies.)
    h2 = (jnp.dot(h_code.astype(jnp.bfloat16), w2c_ref[...],
                  preferred_element_type=jnp.float32)
          + jnp.dot(h_desc.astype(jnp.bfloat16), w2d_ref[...],
                    preferred_element_type=jnp.float32)
          + b2_ref[...])
    h2 = jnp.maximum(h2, 0.0)

    # fc3 + ReLU
    h3 = jnp.dot(h2.astype(jnp.bfloat16), w3_ref[...],
                 preferred_element_type=jnp.float32)
    h3 = jnp.maximum(h3 + b3_ref[...], 0.0)              # (tm, 128) f32

    # fc4 (K=128, N=1): VPU multiply + XLU lane reduce (no N=1 MXU pass),
    # then flip the (tm, 1) column into a lane-dense (1, tm) row so the store
    # is a dense slab instead of tm/8 masked partial stores.
    w4_row = w4_ref[...].astype(jnp.float32)              # (1, 128)
    out_col = jnp.sum(h3 * w4_row, axis=-1, keepdims=True) + b4_ref[...]
    out_ref[...] = out_col.T.astype(out_ref.dtype)        # (1, tm)


def function_classifier_forward(code_emb, desc_emb, params, *, block_m=1024):
    """params: bf16 (in, out) weights (w2 pre-split), f32 (1, out) biases,
    w4 stored as a (1, 128) row.  Inputs may be f32 or bf16."""
    code2d = code_emb.reshape(-1, 768)
    desc2d = desc_emb.reshape(-1, 768)
    B = code2d.shape[0]

    # Batch tile:
    #   * large (default 1024) to amortize the ~0.35us/step overhead and keep
    #     the MXU fed, while staying inside the 32 MiB scoped-VMEM default on
    #     every generation (v7x's smaller 64 MiB physical VMEM included),
    #   * a multiple of 128 whenever grid > 1 so the lane-dense (1, tm) output
    #     block satisfies the (.., 128) tiling rule,
    #   * ~B/2 when possible so v7x's two TensorCores both get grid steps.
    # TODO(synk): on v5e/v6e (128 MiB VMEM) block_m can be raised to 2048 with
    # a larger vmem_limit_bytes; keep <=1024 on v7x.
    if B < 256:
        tm = B                    # single full-array block, no padding needed
    else:
        tm = min(block_m, max(128, (B // 2 // 128) * 128))
    grid = pl.cdiv(B, tm)
    out_cols = grid * tm          # >= B; tail lanes are garbage, sliced off

    def act_map(i):
        return (i, 0)

    def out_map(i):
        return (0, i)

    def const_map(i):
        return (0, 0)

    def full_spec(arr):
        # Whole (small) parameter resident in VMEM; constant index map means
        # it is DMA'd once and reused across all grid steps.
        return pl.BlockSpec(arr.shape, const_map)

    in_specs = [
        pl.BlockSpec((tm, 768), act_map),          # code tile
        pl.BlockSpec((tm, 768), act_map),          # desc tile
        full_spec(params["w1c"]), full_spec(params["b1c"]),
        full_spec(params["w1d"]), full_spec(params["b1d"]),
        full_spec(params["w2c"]), full_spec(params["w2d"]), full_spec(params["b2"]),
        full_spec(params["w3"]), full_spec(params["b3"]),
        full_spec(params["w4"]), full_spec(params["b4"]),
    ]
    out_spec = pl.BlockSpec((1, tm), out_map)

    out_row = pl.pallas_call(
        _mlp_kernel,
        out_shape=jax.ShapeDtypeStruct((1, out_cols), jnp.float32),
        grid_spec=pltpu.PrefetchScalarGridSpec(
            num_scalar_prefetch=0,
            grid=(grid,),
            in_specs=in_specs,
            out_specs=out_spec,
        ),
        compiler_params=pltpu.CompilerParams(
            dimension_semantics=("parallel",)),
    )(
        code2d, desc2d,
        params["w1c"], params["b1c"],
        params["w1d"], params["b1d"],
        params["w2c"], params["w2d"], params["b2"],
        params["w3"], params["b3"],
        params["w4"], params["b4"],
    )
    return out_row[0, :B].reshape(B, 1)


def init_params(key):
    """Deterministic synthetic parameters, matching nn.Linear shapes.

    Weights stored bf16 in (in_features, out_features) layout; biases f32
    (1, out).  fc2 is pre-split into its code/desc halves; fc4's weight is a
    (1, 128) row for the VPU/XLU reduce."""
    ks = jax.random.split(key, 10)

    def linear(kw, kb, fan_in, fan_out):
        bound = 1.0 / jnp.sqrt(fan_in)
        w = jax.random.uniform(kw, (fan_in, fan_out), jnp.float32, -bound, bound)
        b = jax.random.uniform(kb, (1, fan_out), jnp.float32, -bound, bound)
        return w.astype(jnp.bfloat16), b

    w1c, b1c = linear(ks[0], ks[1], 768, 256)   # fc1_code
    w1d, b1d = linear(ks[2], ks[3], 768, 256)   # fc1_desc
    w2, b2 = linear(ks[4], ks[5], 512, 256)     # fc2
    w3, b3 = linear(ks[6], ks[7], 256, 128)     # fc3
    w4_col, b4 = linear(ks[8], ks[9], 128, 1)   # fc4
    return dict(w1c=w1c, b1c=b1c, w1d=w1d, b1d=b1d,
                w2c=w2[:256], w2d=w2[256:], b2=b2,
                w3=w3, b3=b3,
                w4=w4_col.reshape(1, 128), b4=b4)


def reference_forward(code_emb, desc_emb, p):
    """Pure-JAX reference mirroring the kernel's bf16/f32 mixed precision."""
    c = code_emb.reshape(-1, 768).astype(jnp.bfloat16)
    d = desc_emb.reshape(-1, 768).astype(jnp.bfloat16)

    def mm(x, w):
        return jnp.dot(x, w, preferred_element_type=jnp.float32)

    hc = jax.nn.relu(mm(c, p["w1c"]) + p["b1c"])
    hd = jax.nn.relu(mm(d, p["w1d"]) + p["b1d"])
    w2_full = jnp.concatenate([p["w2c"], p["w2d"]], axis=0)
    comb = jnp.concatenate([hc, hd], axis=1).astype(jnp.bfloat16)
    x = jax.nn.relu(mm(comb, w2_full) + p["b2"])
    x = jax.nn.relu(mm(x.astype(jnp.bfloat16), p["w3"]) + p["b3"])
    return jnp.sum(x * p["w4"].astype(jnp.float32), axis=-1,
                   keepdims=True) + p["b4"]


if __name__ == "__main__":
    key = jax.random.PRNGKey(0)
    k_params, k_code, k_desc = jax.random.split(key, 3)

    params = init_params(k_params)

    # Small single-block case (B < 256 -> grid = 1).
    B = 8
    code_emb = jax.random.normal(k_code, (B, 768), jnp.float32)
    desc_emb = jax.random.normal(k_desc, (B, 768), jnp.float32)

    out = function_classifier_forward(code_emb, desc_emb, params)
    out = jax.block_until_ready(out)
    ref = reference_forward(code_emb, desc_emb, params)
    assert out.shape == (B, 1), out.shape
    assert jnp.allclose(out, ref, atol=1e-2, rtol=1e-2), (
        f"max abs diff {jnp.max(jnp.abs(out - ref))}")

    # Multi-block case with a partial last block (B = 300 -> tm=128, grid=3).
    B2 = 300
    code_emb2 = jax.random.normal(jax.random.fold_in(k_code, 1),
                                  (B2, 768), jnp.float32)
    desc_emb2 = jax.random.normal(jax.random.fold_in(k_desc, 1),
                                  (B2, 768), jnp.float32)
    out2 = function_classifier_forward(code_emb2, desc_emb2, params)
    out2 = jax.block_until_ready(out2)
    ref2 = reference_forward(code_emb2, desc_emb2, params)
    assert out2.shape == (B2, 1), out2.shape
    assert jnp.allclose(out2, ref2, atol=1e-2, rtol=1e-2), (
        f"max abs diff {jnp.max(jnp.abs(out2 - ref2))}")

    print("KERNEL_OK")
</pallas_src>

<mosaic_0001>
module attributes {stable_mosaic.version = 11 : i64} {
  func.func @_mlp_kernel(%arg0: i32, %arg1: memref<8x768xf32, #tpu.memory_space<vmem>>, %arg2: memref<8x768xf32, #tpu.memory_space<vmem>>, %arg3: memref<768x256xbf16, #tpu.memory_space<vmem>>, %arg4: memref<1x256xf32, #tpu.memory_space<vmem>>, %arg5: memref<768x256xbf16, #tpu.memory_space<vmem>>, %arg6: memref<1x256xf32, #tpu.memory_space<vmem>>, %arg7: memref<256x256xbf16, #tpu.memory_space<vmem>>, %arg8: memref<256x256xbf16, #tpu.memory_space<vmem>>, %arg9: memref<1x256xf32, #tpu.memory_space<vmem>>, %arg10: memref<256x128xbf16, #tpu.memory_space<vmem>>, %arg11: memref<1x128xf32, #tpu.memory_space<vmem>>, %arg12: memref<1x128xbf16, #tpu.memory_space<vmem>>, %arg13: memref<1x1xf32, #tpu.memory_space<vmem>>, %arg14: memref<1x8xf32, #tpu.memory_space<vmem>>) attributes {dimension_semantics = [#tpu.dimension_semantics<parallel>], iteration_bounds = array<i64: 1>, scalar_prefetch = 0 : i64, scratch_operands = 0 : i64, tpu.core_type = #tpu.core_type<tc>, window_params = [{transform_indices = @transform_0, window_bounds = array<i64: 8, 768>}, {transform_indices = @transform_1, window_bounds = array<i64: 8, 768>}, {pipeline_mode = #tpu.pipeline_mode<synchronous>, transform_indices = @transform_2, window_bounds = array<i64: 768, 256>}, {pipeline_mode = #tpu.pipeline_mode<synchronous>, transform_indices = @transform_3, window_bounds = array<i64: 1, 256>}, {pipeline_mode = #tpu.pipeline_mode<synchronous>, transform_indices = @transform_4, window_bounds = array<i64: 768, 256>}, {pipeline_mode = #tpu.pipeline_mode<synchronous>, transform_indices = @transform_5, window_bounds = array<i64: 1, 256>}, {pipeline_mode = #tpu.pipeline_mode<synchronous>, transform_indices = @transform_6, window_bounds = array<i64: 256, 256>}, {pipeline_mode = #tpu.pipeline_mode<synchronous>, transform_indices = @transform_7, window_bounds = array<i64: 256, 256>}, {pipeline_mode = #tpu.pipeline_mode<synchronous>, transform_indices = @transform_8, window_bounds = array<i64: 1, 256>}, {pipeline_mode = #tpu.pipeline_mode<synchronous>, transform_indices = @transform_9, window_bounds = array<i64: 256, 128>}, {pipeline_mode = #tpu.pipeline_mode<synchronous>, transform_indices = @transform_10, window_bounds = array<i64: 1, 128>}, {pipeline_mode = #tpu.pipeline_mode<synchronous>, transform_indices = @transform_11, window_bounds = array<i64: 1, 128>}, {pipeline_mode = #tpu.pipeline_mode<synchronous>, transform_indices = @transform_12, window_bounds = array<i64: 1, 1>}, {transform_indices = @transform_13, window_bounds = array<i64: 1, 8>}]} {
    %c0 = arith.constant 0 : index
    %c0_0 = arith.constant 0 : index
    %0 = vector.load %arg1[%c0, %c0_0] : memref<8x768xf32, #tpu.memory_space<vmem>>, vector<8x768xf32>
    %1 = arith.truncf %0 : vector<8x768xf32> to vector<8x768xbf16>
    %c0_1 = arith.constant 0 : index
    %c0_2 = arith.constant 0 : index
    %2 = vector.load %arg2[%c0_1, %c0_2] : memref<8x768xf32, #tpu.memory_space<vmem>>, vector<8x768xf32>
    %3 = arith.truncf %2 : vector<8x768xf32> to vector<8x768xbf16>
    %c0_3 = arith.constant 0 : index
    %c0_4 = arith.constant 0 : index
    %4 = vector.load %arg3[%c0_3, %c0_4] : memref<768x256xbf16, #tpu.memory_space<vmem>>, vector<768x256xbf16>
    %cst = arith.constant dense<0.000000e+00> : vector<8x256xf32>
    %5 = tpu.matmul %1, %4, %cst {dimension_numbers = #tpu.dot_dimension_numbers<[1], [0], [0], [1], [0, 0, 1, 1], [], []>} : vector<8x768xbf16>, vector<768x256xbf16>, vector<8x256xf32> -> vector<8x256xf32>
    %c0_5 = arith.constant 0 : index
    %c0_6 = arith.constant 0 : index
    %6 = vector.load %arg4[%c0_5, %c0_6] : memref<1x256xf32, #tpu.memory_space<vmem>>, vector<1x256xf32>
    %7 = vector.broadcast %6 : vector<1x256xf32> to vector<8x256xf32>
    %8 = arith.addf %5, %7 : vector<8x256xf32>
    %cst_7 = arith.constant 0.000000e+00 : f32
    %9 = vector.broadcast %cst_7 : f32 to vector<8x256xf32>
    %10 = arith.maximumf %8, %9 : vector<8x256xf32>
    %c0_8 = arith.constant 0 : index
    %c0_9 = arith.constant 0 : index
    %11 = vector.load %arg5[%c0_8, %c0_9] : memref<768x256xbf16, #tpu.memory_space<vmem>>, vector<768x256xbf16>
    %cst_10 = arith.constant dense<0.000000e+00> : vector<8x256xf32>
    %12 = tpu.matmul %3, %11, %cst_10 {dimension_numbers = #tpu.dot_dimension_numbers<[1], [0], [0], [1], [0, 0, 1, 1], [], []>} : vector<8x768xbf16>, vector<768x256xbf16>, vector<8x256xf32> -> vector<8x256xf32>
    %c0_11 = arith.constant 0 : index
    %c0_12 = arith.constant 0 : index
    %13 = vector.load %arg6[%c0_11, %c0_12] : memref<1x256xf32, #tpu.memory_space<vmem>>, vector<1x256xf32>
    %14 = vector.broadcast %13 : vector<1x256xf32> to vector<8x256xf32>
    %15 = arith.addf %12, %14 : vector<8x256xf32>
    %cst_13 = arith.constant 0.000000e+00 : f32
    %16 = vector.broadcast %cst_13 : f32 to vector<8x256xf32>
    %17 = arith.maximumf %15, %16 : vector<8x256xf32>
    %18 = arith.truncf %10 : vector<8x256xf32> to vector<8x256xbf16>
    %c0_14 = arith.constant 0 : index
    %c0_15 = arith.constant 0 : index
    %19 = vector.load %arg7[%c0_14, %c0_15] : memref<256x256xbf16, #tpu.memory_space<vmem>>, vector<256x256xbf16>
    %cst_16 = arith.constant dense<0.000000e+00> : vector<8x256xf32>
    %20 = tpu.matmul %18, %19, %cst_16 {dimension_numbers = #tpu.dot_dimension_numbers<[1], [0], [0], [1], [0, 0, 1, 1], [], []>} : vector<8x256xbf16>, vector<256x256xbf16>, vector<8x256xf32> -> vector<8x256xf32>
    %21 = arith.truncf %17 : vector<8x256xf32> to vector<8x256xbf16>
    %c0_17 = arith.constant 0 : index
    %c0_18 = arith.constant 0 : index
    %22 = vector.load %arg8[%c0_17, %c0_18] : memref<256x256xbf16, #tpu.memory_space<vmem>>, vector<256x256xbf16>
    %cst_19 = arith.constant dense<0.000000e+00> : vector<8x256xf32>
    %23 = tpu.matmul %21, %22, %cst_19 {dimension_numbers = #tpu.dot_dimension_numbers<[1], [0], [0], [1], [0, 0, 1, 1], [], []>} : vector<8x256xbf16>, vector<256x256xbf16>, vector<8x256xf32> -> vector<8x256xf32>
    %24 = arith.addf %20, %23 : vector<8x256xf32>
    %c0_20 = arith.constant 0 : index
    %c0_21 = arith.constant 0 : index
    %25 = vector.load %arg9[%c0_20, %c0_21] : memref<1x256xf32, #tpu.memory_space<vmem>>, vector<1x256xf32>
    %26 = vector.broadcast %25 : vector<1x256xf32> to vector<8x256xf32>
    %27 = arith.addf %24, %26 : vector<8x256xf32>
    %cst_22 = arith.constant 0.000000e+00 : f32
    %28 = vector.broadcast %cst_22 : f32 to vector<8x256xf32>
    %29 = arith.maximumf %27, %28 : vector<8x256xf32>
    %30 = arith.truncf %29 : vector<8x256xf32> to vector<8x256xbf16>
    %c0_23 = arith.constant 0 : index
    %c0_24 = arith.constant 0 : index
    %31 = vector.load %arg10[%c0_23, %c0_24] : memref<256x128xbf16, #tpu.memory_space<vmem>>, vector<256x128xbf16>
    %cst_25 = arith.constant dense<0.000000e+00> : vector<8x128xf32>
    %32 = tpu.matmul %30, %31, %cst_25 {dimension_numbers = #tpu.dot_dimension_numbers<[1], [0], [0], [1], [0, 0, 1, 1], [], []>} : vector<8x256xbf16>, vector<256x128xbf16>, vector<8x128xf32> -> vector<8x128xf32>
    %c0_26 = arith.constant 0 : index
    %c0_27 = arith.constant 0 : index
    %33 = vector.load %arg11[%c0_26, %c0_27] : memref<1x128xf32, #tpu.memory_space<vmem>>, vector<1x128xf32>
    %34 = vector.broadcast %33 : vector<1x128xf32> to vector<8x128xf32>
    %35 = arith.addf %32, %34 : vector<8x128xf32>
    %cst_28 = arith.constant 0.000000e+00 : f32
    %36 = vector.broadcast %cst_28 : f32 to vector<8x128xf32>
    %37 = arith.maximumf %35, %36 : vector<8x128xf32>
    %c0_29 = arith.constant 0 : index
    %c0_30 = arith.constant 0 : index
    %38 = vector.load %arg12[%c0_29, %c0_30] : memref<1x128xbf16, #tpu.memory_space<vmem>>, vector<1x128xbf16>
    %39 = arith.extf %38 : vector<1x128xbf16> to vector<1x128xf32>
    %40 = vector.broadcast %39 : vector<1x128xf32> to vector<8x128xf32>
    %41 = arith.mulf %37, %40 : vector<8x128xf32>
    %cst_31 = arith.constant dense<0.000000e+00> : vector<8xf32>
    %42 = vector.multi_reduction <add>, %41, %cst_31 [1] : vector<8x128xf32> to vector<8xf32>
    %43 = vector.shape_cast %42 : vector<8xf32> to vector<8x1xf32>
    %c0_32 = arith.constant 0 : index
    %c0_33 = arith.constant 0 : index
    %44 = vector.load %arg13[%c0_32, %c0_33] : memref<1x1xf32, #tpu.memory_space<vmem>>, vector<1x1xf32>
    %45 = vector.broadcast %44 : vector<1x1xf32> to vector<8x1xf32>
    %46 = arith.addf %43, %45 : vector<8x1xf32>
    %47 = tpu.transpose %46, [1, 0] : vector<8x1xf32> -> vector<1x8xf32>
    %c0_34 = arith.constant 0 : index
    %c0_35 = arith.constant 0 : index
    %48 = vector.load %arg14[%c0_34, %c0_35] : memref<1x8xf32, #tpu.memory_space<vmem>>, vector<1x8xf32>
    tpu.vector_store %arg14[%c0_34, %c0_35], %47 {strides = array<i32>} : memref<1x8xf32, #tpu.memory_space<vmem>>, vector<1x8xf32>,
    return
  }
  func.func @transform_0(%arg0: i32) -> (i32, i32) {
    %c0_i32 = arith.constant 0 : i32
    %c0_i32_0 = arith.constant 0 : i32
    return %arg0, %c0_i32 : i32, i32
  }
  func.func @transform_1(%arg0: i32) -> (i32, i32) {
    %c0_i32 = arith.constant 0 : i32
    %c0_i32_0 = arith.constant 0 : i32
    return %arg0, %c0_i32 : i32, i32
  }
  func.func @transform_2(%arg0: i32) -> (i32, i32) {
    %c0_i32 = arith.constant 0 : i32
    %c0_i32_0 = arith.constant 0 : i32
    %c0_i32_1 = arith.constant 0 : i32
    return %c0_i32, %c0_i32_0 : i32, i32
  }
  func.func @transform_3(%arg0: i32) -> (i32, i32) {
    %c0_i32 = arith.constant 0 : i32
    %c0_i32_0 = arith.constant 0 : i32
    %c0_i32_1 = arith.constant 0 : i32
    return %c0_i32, %c0_i32_0 : i32, i32
  }
  func.func @transform_4(%arg0: i32) -> (i32, i32) {
    %c0_i32 = arith.constant 0 : i32
    %c0_i32_0 = arith.constant 0 : i32
    %c0_i32_1 = arith.constant 0 : i32
    return %c0_i32, %c0_i32_0 : i32, i32
  }
  func.func @transform_5(%arg0: i32) -> (i32, i32) {
    %c0_i32 = arith.constant 0 : i32
    %c0_i32_0 = arith.constant 0 : i32
    %c0_i32_1 = arith.constant 0 : i32
    return %c0_i32, %c0_i32_0 : i32, i32
  }
  func.func @transform_6(%arg0: i32) -> (i32, i32) {
    %c0_i32 = arith.constant 0 : i32
    %c0_i32_0 = arith.constant 0 : i32
    %c0_i32_1 = arith.constant 0 : i32
    return %c0_i32, %c0_i32_0 : i32, i32
  }
  func.func @transform_7(%arg0: i32) -> (i32, i32) {
    %c0_i32 = arith.constant 0 : i32
    %c0_i32_0 = arith.constant 0 : i32
    %c0_i32_1 = arith.constant 0 : i32
    return %c0_i32, %c0_i32_0 : i32, i32
  }
  func.func @transform_8(%arg0: i32) -> (i32, i32) {
    %c0_i32 = arith.constant 0 : i32
    %c0_i32_0 = arith.constant 0 : i32
    %c0_i32_1 = arith.constant 0 : i32
    return %c0_i32, %c0_i32_0 : i32, i32
  }
  func.func @transform_9(%arg0: i32) -> (i32, i32) {
    %c0_i32 = arith.constant 0 : i32
    %c0_i32_0 = arith.constant 0 : i32
    %c0_i32_1 = arith.constant 0 : i32
    return %c0_i32, %c0_i32_0 : i32, i32
  }
  func.func @transform_10(%arg0: i32) -> (i32, i32) {
    %c0_i32 = arith.constant 0 : i32
    %c0_i32_0 = arith.constant 0 : i32
    %c0_i32_1 = arith.constant 0 : i32
    return %c0_i32, %c0_i32_0 : i32, i32
  }
  func.func @transform_11(%arg0: i32) -> (i32, i32) {
    %c0_i32 = arith.constant 0 : i32
    %c0_i32_0 = arith.constant 0 : i32
    %c0_i32_1 = arith.constant 0 : i32
    return %c0_i32, %c0_i32_0 : i32, i32
  }
  func.func @transform_12(%arg0: i32) -> (i32, i32) {
    %c0_i32 = arith.constant 0 : i32
    %c0_i32_0 = arith.constant 0 : i32
    %c0_i32_1 = arith.constant 0 : i32
    return %c0_i32, %c0_i32_0 : i32, i32
  }
  func.func @transform_13(%arg0: i32) -> (i32, i32) {
    %c0_i32 = arith.constant 0 : i32
    %c0_i32_0 = arith.constant 0 : i32
    return %c0_i32, %arg0 : i32, i32
  }
}

</mosaic_0001>

<bundles_post_ra>
// kernel: tpu_custom_call.1
= control target key start
LH: loop header
LB: loop body
LE: loop exit
PB: predicated region body
PF: predicated region fallthrough
CT: control target
= control target key end

     0   :  { %s3456_s0 = inlined_call_operand.hbm [shape: f32[8,768], index: 0, kind: input, shape index: {}]   ;;  %s3457_s1 = inlined_call_operand.hbm [shape: f32[8,768], index: 1, kind: input, shape index: {}]   ;;  %s3458_s2 = inlined_call_operand.hbm [shape: bf16[768,256], index: 2, kind: input, shape index: {}]   ;;  %s3459_s3 = inlined_call_operand.vmem [shape: f32[1,256], index: 3, kind: input, shape index: {}]   ;;  %s3460_s4 = inlined_call_operand.hbm [shape: bf16[768,256], index: 4, kind: input, shape index: {}]   ;;  %s3461_s5 = inlined_call_operand.vmem [shape: f32[1,256], index: 5, kind: input, shape index: {}]   ;;  %s3462_s6 = inlined_call_operand.hbm [shape: bf16[256,256], index: 6, kind: input, shape index: {}]   ;;  %s3463_s7 = inlined_call_operand.hbm [shape: bf16[256,256], index: 7, kind: input, shape index: {}]   ;;  %s3464_s8 = inlined_call_operand.vmem [shape: f32[1,256], index: 8, kind: input, shape index: {}]   ;;  %s3465_s9 = inlined_call_operand.hbm [shape: bf16[256,128], index: 9, kind: input, shape index: {}]   ;;  %s3466_s10 = inlined_call_operand.vmem [shape: f32[1,128], index: 10, kind: input, shape index: {}]   ;;  %s3467_s11 = inlined_call_operand.vmem [shape: bf16[1,128], index: 11, kind: input, shape index: {}]   ;;  %s3468_s12 = inlined_call_operand.<no memory space> [shape: f32[1,1], index: 12, kind: input, shape index: {}]   ;;  %s3469_s13 = inlined_call_operand.hbm [shape: f32[1,8], index: 13, kind: output, shape index: {}]  }
   0x1   :  { %v18_v0 = vstv %s3468_s12 }
   0x2   :  { %19 = vst [vmem:[#allocation2] sm:$0x1] %v18_v0 }
   0x3   :  { %20 = vsyncpa [#allocation4], 0 }
   0x4   :  { %21 = vsyncpa [#allocation7], 0 }
   0x5   :  { %22 = vsyncpa [#allocation10], 0 }
   0x6   :  { %23 = vsyncpa [#allocation13], 0 }
   0x7   :  { %24 = vsyncpa [#allocation5], 0  ;;  %s3237_s27 = smov [#allocation6]   ;;  %s3051_s14 = scalar_lea.hbm %s3457_s1, 768 }
   0x8   :  { %s41_s28 = sshll.u32 %s3237_s27, 4  ;;  %p3052_p0 = scmp.ne.s32.totalorder %s3457_s1, %s3051_s14  ;;  %s42_s28 = int_to_ptr.vmem [resolvable:$true] %s41_s28 }
   0x9   :  { %p3055_p1 = scmp.lt.u32.totalorder %s3051_s14, %s3457_s1 }
   0xb   :  { %p3057_p2 = pnand %p3055_p1, %p3052_p0 }
   0xd   :  { %3060 = shalt.err (!%p3057_p2)
}
   0xe   :  { %s3061_s12 = scalar_lea.vmem %s42_s28, 768  ;;  %p3066_p4 = scmp.lt.s32.totalorder %s42_s28, %s42_s28 }
   0xf   :  { %p3062_p3 = scmp.ne.s32.totalorder %s42_s28, %s3061_s12  ;;  %p3067_p5 = scmp.lt.s32.totalorder %s3061_s12, %s3061_s12 }
  0x11   :  { %p3068_p6 = por %p3067_p5, %p3066_p4 }
  0x13   :  { %p3069_p7 = pnand %p3068_p6, %p3062_p3 }
  0x15   :  { %3072 = shalt.err (!%p3069_p7)
}
  0x16   :  { %44 = dma.hbm_to_vmem [thread:$0]  %s3457_s1, 768, %s42_s28, [#allocation7]  }
  0x17   :  { %s3238_s21 = smov [#allocation9]   ;;  %s3239_s23 = smov [#allocation12]  }
  0x18   :  { %s64_s22 = sshll.u32 %s3238_s21, 4  ;;  %s90_s24 = sshll.u32 %s3239_s23, 4  ;;  %s65_s22 = int_to_ptr.vmem [resolvable:$true] %s64_s22  ;;  %s91_s24 = int_to_ptr.vmem [resolvable:$true] %s90_s24 }
  0x19   :  { %s3073_s27 = scalar_lea.hbm %s3460_s4, 12288 }
  0x1a   :  { %p3074_p8 = scmp.ne.s32.totalorder %s3460_s4, %s3073_s27  ;;  %p3077_p9 = scmp.lt.u32.totalorder %s3073_s27, %s3460_s4 }
  0x1c   :  { %p3079_p10 = pnand %p3077_p9, %p3074_p8 }
  0x1e   :  { %3082 = shalt.err (!%p3079_p10)
}
  0x1f   :  { %s3083_s1 = scalar_lea.vmem %s65_s22, 12288  ;;  %p3088_p12 = scmp.lt.s32.totalorder %s65_s22, %s65_s22 }
  0x20   :  { %p3084_p11 = scmp.ne.s32.totalorder %s65_s22, %s3083_s1  ;;  %p3089_p13 = scmp.lt.s32.totalorder %s3083_s1, %s3083_s1 }
  0x22   :  { %p3090_p0 = por %p3089_p13, %p3088_p12 }
  0x24   :  { %p3091_p1 = pnand %p3090_p0, %p3084_p11 }
  0x26   :  { %3094 = shalt.err (!%p3091_p1)
}
  0x27   :  { %s3240_s28 = smov 128   ;;  %s3241_s16 = smov 8  }
  0x28   :  { %70 = dma.hbm_to_vmem [thread:$0]  %s3460_s4, 12288, %s65_s22, [#allocation10], %s3240_s28, %s3240_s28, %s3241_s16  }
  0x29   :  { %s3095_s20 = scalar_lea.hbm %s3463_s7, 4096 }
  0x2a   :  { %p3096_p2 = scmp.ne.s32.totalorder %s3463_s7, %s3095_s20  ;;  %p3099_p3 = scmp.lt.u32.totalorder %s3095_s20, %s3463_s7 }
  0x2c   :  { %p3101_p4 = pnand %p3099_p3, %p3096_p2 }
  0x2e   :  { %3104 = shalt.err (!%p3101_p4)
}
  0x2f   :  { %s3105_s27 = scalar_lea.vmem %s91_s24, 4096  ;;  %p3110_p6 = scmp.lt.s32.totalorder %s91_s24, %s91_s24 }
  0x30   :  { %p3106_p5 = scmp.ne.s32.totalorder %s91_s24, %s3105_s27  ;;  %p3111_p7 = scmp.lt.s32.totalorder %s3105_s27, %s3105_s27 }
  0x32   :  { %p3112_p8 = por %p3111_p7, %p3110_p6 }
  0x34   :  { %p3113_p9 = pnand %p3112_p8, %p3106_p5 }
  0x36   :  { %3116 = shalt.err (!%p3113_p9)
}
  0x37   :  { %96 = dma.hbm_to_vmem [thread:$0]  %s3463_s7, 4096, %s91_s24, [#allocation13], %s3240_s28, %s3240_s28, %s3241_s16  }
  0x38   :  { %s3242_s29 = smov [#allocation3]   ;;  %s3243_s14 = smov [#allocation8]  }
  0x39   :  { %s31_s30 = sshll.u32 %s3242_s29, 4  ;;  %s50_s15 = sshll.u32 %s3243_s14, 4  ;;  %s32_s30 = int_to_ptr.vmem [resolvable:$true] %s31_s30  ;;  %s51_s15 = int_to_ptr.vmem [resolvable:$true] %s50_s15 }
  0x3a   :  { %s3117_s18 = scalar_lea.hbm %s3456_s0, 768 }
  0x3b   :  { %p3118_p10 = scmp.ne.s32.totalorder %s3456_s0, %s3117_s18  ;;  %p3121_p11 = scmp.lt.u32.totalorder %s3117_s18, %s3456_s0 }
  0x3d   :  { %p3123_p12 = pnand %p3121_p11, %p3118_p10 }
  0x3f   :  { %3126 = shalt.err (!%p3123_p12)
}
  0x40   :  { %s3127_s7 = scalar_lea.vmem %s32_s30, 768  ;;  %p3132_p0 = scmp.lt.s32.totalorder %s32_s30, %s32_s30 }
  0x41   :  { %p3128_p13 = scmp.ne.s32.totalorder %s32_s30, %s3127_s7  ;;  %p3133_p1 = scmp.lt.s32.totalorder %s3127_s7, %s3127_s7 }
  0x43   :  { %p3134_p2 = por %p3133_p1, %p3132_p0 }
  0x45   :  { %p3135_p3 = pnand %p3134_p2, %p3128_p13 }
  0x47   :  { %3138 = shalt.err (!%p3135_p3)
}
  0x48   :  { %34 = dma.hbm_to_vmem [thread:$0]  %s3456_s0, 768, %s32_s30, [#allocation4]  }
  0x49   :  { %s3139_s27 = scalar_lea.hbm %s3458_s2, 12288 }
  0x4a   :  { %p3140_p4 = scmp.ne.s32.totalorder %s3458_s2, %s3139_s27  ;;  %p3143_p5 = scmp.lt.u32.totalorder %s3139_s27, %s3458_s2 }
  0x4c   :  { %p3145_p6 = pnand %p3143_p5, %p3140_p4 }
  0x4e   :  { %3148 = shalt.err (!%p3145_p6)
}
  0x4f   :  { %s3149_s1 = scalar_lea.vmem %s51_s15, 12288  ;;  %p3154_p8 = scmp.lt.s32.totalorder %s51_s15, %s51_s15 }
  0x50   :  { %p3150_p7 = scmp.ne.s32.totalorder %s51_s15, %s3149_s1  ;;  %p3155_p9 = scmp.lt.s32.totalorder %s3149_s1, %s3149_s1 }
  0x52   :  { %p3156_p10 = por %p3155_p9, %p3154_p8 }
  0x54   :  { %p3157_p11 = pnand %p3156_p10, %p3150_p7 }
  0x56   :  { %3160 = shalt.err (!%p3157_p11)
}
  0x57   :  { %56 = dma.hbm_to_vmem [thread:$0]  %s3458_s2, 12288, %s51_s15, [#allocation7], %s3240_s28, %s3240_s28, %s3241_s16  }
  0x58   :  { %s3244_s17 = smov [#allocation11]   ;;  %s3245_s12 = smov [#allocation14]  }
  0x59   :  { %s78_s18 = sshll.u32 %s3244_s17, 4  ;;  %s104_s19 = sshll.u32 %s3245_s12, 4  ;;  %s79_s18 = int_to_ptr.vmem [resolvable:$true] %s78_s18  ;;  %s105_s19 = int_to_ptr.vmem [resolvable:$true] %s104_s19 }
  0x5a   :  { %s3161_s7 = scalar_lea.hbm %s3462_s6, 4096 }
  0x5b   :  { %p3162_p12 = scmp.ne.s32.totalorder %s3462_s6, %s3161_s7  ;;  %p3165_p13 = scmp.lt.u32.totalorder %s3161_s7, %s3462_s6 }
  0x5d   :  { %p3167_p0 = pnand %p3165_p13, %p3162_p12 }
  0x5f   :  { %3170 = shalt.err (!%p3167_p0)
}
  0x60   :  { %s3171_s2 = scalar_lea.vmem %s79_s18, 4096  ;;  %p3176_p2 = scmp.lt.s32.totalorder %s79_s18, %s79_s18 }
  0x61   :  { %p3172_p1 = scmp.ne.s32.totalorder %s79_s18, %s3171_s2  ;;  %p3177_p3 = scmp.lt.s32.totalorder %s3171_s2, %s3171_s2 }
  0x63   :  { %p3178_p4 = por %p3177_p3, %p3176_p2 }
  0x65   :  { %p3179_p5 = pnand %p3178_p4, %p3172_p1 }
  0x67   :  { %3182 = shalt.err (!%p3179_p5)
}
  0x68   :  { %84 = dma.hbm_to_vmem [thread:$0]  %s3462_s6, 4096, %s79_s18, [#allocation10], %s3240_s28, %s3240_s28, %s3241_s16  }
  0x69   :  { %s3183_s29 = scalar_lea.hbm %s3465_s9, 2048 }
  0x6a   :  { %p3184_p6 = scmp.ne.s32.totalorder %s3465_s9, %s3183_s29  ;;  %p3187_p7 = scmp.lt.u32.totalorder %s3183_s29, %s3465_s9 }
  0x6c   :  { %p3189_p8 = pnand %p3187_p7, %p3184_p6 }
  0x6e   :  { %3192 = shalt.err (!%p3189_p8)
}
  0x6f   :  { %s3193_s17 = scalar_lea.vmem %s105_s19, 2048  ;;  %p3198_p10 = scmp.lt.s32.totalorder %s105_s19, %s105_s19 }
  0x70   :  { %p3194_p9 = scmp.ne.s32.totalorder %s105_s19, %s3193_s17  ;;  %p3199_p11 = scmp.lt.s32.totalorder %s3193_s17, %s3193_s17 }
  0x72   :  { %p3200_p12 = por %p3199_p11, %p3198_p10 }
  0x74   :  { %p3201_p13 = pnand %p3200_p12, %p3194_p9 }
  0x76   :  { %3204 = shalt.err (!%p3201_p13)
}
  0x77   :  { %s3246_s6 = smov 64   ;;  %s3247_s28 = smov 4  }
  0x78   :  { %110 = dma.hbm_to_vmem [thread:$0]  %s3465_s9, 2048, %s105_s19, [#allocation13], %s3246_s6, %s3246_s6, %s3247_s28  }
  0x79   :  { %3227 = dma.done.wait [#allocation4], 768  }
  0x7a   :  { %3228 = vsyncadd [#allocation4], 4294966528 }
  0x7b   :  { %3229 = dma.done.wait [#allocation7], 13056  }
  0x7c   :  { %3230 = vsyncadd [#allocation7], 4294954240 }
  0x7d   :  { %3231 = dma.done.wait [#allocation10], 16384  }
  0x7e   :  { %3232 = vsyncadd [#allocation10], 4294950912 }
  0x7f   :  { %3233 = dma.done.wait [#allocation13], 6144  }
  0x80   :  { %3234 = vsyncadd [#allocation13], 4294961152  ;;  %v2651_v1 = vld [vmem:[#allocation8 + $0x4] ss:$8 sps:$4 sm:$0xff]   ;;  %v2655_v3 = vld [vmem:[#allocation8] ss:$8 sps:$4 sm:$0xff]  }
  0x81   :  { %v2653_v2 = vld [vmem:[#allocation9 + $0x4] ss:$8 sps:$4 sm:$0xff]   ;;  %751 = vmatprep.subr.bf16.mxu0 %v2651_v1  ;;  %v2656_v4 = vld [vmem:[#allocation9] ss:$8 sps:$4 sm:$0xff]   ;;  %v2657_v5 = vld [vmem:[#allocation8 + $0x14] ss:$8 sps:$4 sm:$0xff]  }
  0x82   :  { %1464 = vmatprep.subr.bf16.mxu1 %v2653_v2  ;;  %752 = vmatpush1.bf16.msra.mxu0 %v2655_v3  ;;  %v2659_v6 = vld [vmem:[#allocation9 + $0x14] ss:$8 sps:$4 sm:$0xff]   ;;  %v2661_v7 = vld [vmem:[#allocation8 + $0x10] ss:$8 sps:$4 sm:$0xff]   ;;  %v2663_v9 = vld [vmem:[#allocation8 + $0x24] ss:$8 sps:$4 sm:$0xff]  }
  0x83   :  { %1465 = vmatpush1.bf16.msra.mxu1 %v2656_v4  ;;  %753 = vmatprep.subr.bf16.mxu0 %v2657_v5  ;;  %v2662_v8 = vld [vmem:[#allocation9 + $0x10] ss:$8 sps:$4 sm:$0xff]   ;;  %v2665_v10 = vld [vmem:[#allocation9 + $0x24] ss:$8 sps:$4 sm:$0xff]   ;;  %v2667_v11 = vld [vmem:[#allocation8 + $0x20] ss:$8 sps:$4 sm:$0xff]  }
  0x84   :  { %1466 = vmatprep.subr.bf16.mxu1 %v2659_v6  ;;  %v2668_v12 = vld [vmem:[#allocation9 + $0x20] ss:$8 sps:$4 sm:$0xff]   ;;  %v2669_v13 = vld [vmem:[#allocation8 + $0x34] ss:$8 sps:$4 sm:$0xff]   ;;  %v2673_v15 = vld [vmem:[#allocation8 + $0x30] ss:$8 sps:$4 sm:$0xff]  }
  0x85   :  { %v2671_v14 = vld [vmem:[#allocation9 + $0x34] ss:$8 sps:$4 sm:$0xff]   ;;  %v2674_v16 = vld [vmem:[#allocation9 + $0x30] ss:$8 sps:$4 sm:$0xff]   ;;  %v2675_v17 = vld [vmem:[#allocation8 + $0x44] ss:$8 sps:$4 sm:$0xff]  }
  0x86   :  { %754 = vmatpush1.bf16.msra.mxu0 %v2661_v7  ;;  %v2677_v18 = vld [vmem:[#allocation9 + $0x44] ss:$8 sps:$4 sm:$0xff]   ;;  %v2679_v19 = vld [vmem:[#allocation8 + $0x40] ss:$8 sps:$4 sm:$0xff]   ;;  %v2681_v21 = vld [vmem:[#allocation8 + $0x54] ss:$8 sps:$4 sm:$0xff]  }
  0x87   :  { %1467 = vmatpush1.bf16.msra.mxu1 %v2662_v8  ;;  %755 = vmatprep.subr.bf16.mxu0 %v2663_v9  ;;  %v2680_v20 = vld [vmem:[#allocation9 + $0x40] ss:$8 sps:$4 sm:$0xff]   ;;  %v2683_v22 = vld [vmem:[#allocation9 + $0x54] ss:$8 sps:$4 sm:$0xff]   ;;  %v2685_v23 = vld [vmem:[#allocation8 + $0x50] ss:$8 sps:$4 sm:$0xff]  }
  0x88   :  { %1468 = vmatprep.subr.bf16.mxu1 %v2665_v10  ;;  %v2686_v24 = vld [vmem:[#allocation9 + $0x50] ss:$8 sps:$4 sm:$0xff]   ;;  %v2687_v25 = vld [vmem:[#allocation8 + $0x64] ss:$8 sps:$4 sm:$0xff]   ;;  %v2691_v27 = vld [vmem:[#allocation8 + $0x60] ss:$8 sps:$4 sm:$0xff]  }
  0x89   :  { %v2689_v26 = vld [vmem:[#allocation9 + $0x64] ss:$8 sps:$4 sm:$0xff]   ;;  %v2692_v28 = vld [vmem:[#allocation9 + $0x60] ss:$8 sps:$4 sm:$0xff]   ;;  %v2693_v29 = vld [vmem:[#allocation8 + $0x74] ss:$8 sps:$4 sm:$0xff]  }
  0x8a   :  { %756 = vmatpush1.bf16.msra.mxu0 %v2667_v11  ;;  %v2695_v30 = vld [vmem:[#allocation9 + $0x74] ss:$8 sps:$4 sm:$0xff]   ;;  %v2697_v31 = vld [vmem:[#allocation8 + $0x70] ss:$8 sps:$4 sm:$0xff]   ;;  %v2699_v33 = vld [vmem:[#allocation8 + $0x84] ss:$8 sps:$4 sm:$0xff]  }
  0x8b   :  { %1469 = vmatpush1.bf16.msra.mxu1 %v2668_v12  ;;  %757 = vmatprep.subr.bf16.mxu0 %v2669_v13  ;;  %v2698_v32 = vld [vmem:[#allocation9 + $0x70] ss:$8 sps:$4 sm:$0xff]   ;;  %v2701_v34 = vld [vmem:[#allocation9 + $0x84] ss:$8 sps:$4 sm:$0xff]   ;;  %v2703_v35 = vld [vmem:[#allocation8 + $0x80] ss:$8 sps:$4 sm:$0xff]  }
  0x8c   :  { %1470 = vmatprep.subr.bf16.mxu1 %v2671_v14  ;;  %v2704_v36 = vld [vmem:[#allocation9 + $0x80] ss:$8 sps:$4 sm:$0xff]   ;;  %v2705_v37 = vld [vmem:[#allocation8 + $0x94] ss:$8 sps:$4 sm:$0xff]   ;;  %v2709_v39 = vld [vmem:[#allocation8 + $0x90] ss:$8 sps:$4 sm:$0xff]  }
  0x8d   :  { %v2707_v38 = vld [vmem:[#allocation9 + $0x94] ss:$8 sps:$4 sm:$0xff]   ;;  %v2710_v40 = vld [vmem:[#allocation9 + $0x90] ss:$8 sps:$4 sm:$0xff]   ;;  %v2711_v41 = vld [vmem:[#allocation8 + $0xa4] ss:$8 sps:$4 sm:$0xff]  }
  0x8e   :  { %758 = vmatpush1.bf16.msra.mxu0 %v2673_v15  ;;  %v2713_v42 = vld [vmem:[#allocation9 + $0xa4] ss:$8 sps:$4 sm:$0xff]   ;;  %v2715_v43 = vld [vmem:[#allocation8 + $0xa0] ss:$8 sps:$4 sm:$0xff]   ;;  %v2717_v45 = vld [vmem:[#allocation8 + $0xb4] ss:$8 sps:$4 sm:$0xff]  }
  0x8f   :  { %1471 = vmatpush1.bf16.msra.mxu1 %v2674_v16  ;;  %759 = vmatprep.subr.bf16.mxu0 %v2675_v17  ;;  %v2716_v44 = vld [vmem:[#allocation9 + $0xa0] ss:$8 sps:$4 sm:$0xff]   ;;  %v2719_v46 = vld [vmem:[#allocation9 + $0xb4] ss:$8 sps:$4 sm:$0xff]   ;;  %v2721_v48 = vld [vmem:[#allocation8 + $0xb0] ss:$8 sps:$4 sm:$0xff]  }
  0x90   :  { %1472 = vmatprep.subr.bf16.mxu1 %v2677_v18  ;;  %v140_v47 = vld [vmem:[#allocation3 + $0x8] sm:$0xff]  ;;  %v2722_v50 = vld [vmem:[#allocation9 + $0xb0] ss:$8 sps:$4 sm:$0xff]   ;;  %v2729_v57 = vld [vmem:[#allocation8 + $0xd4] ss:$8 sps:$4 sm:$0xff]   ;;  %vm2302_vm0 = vcmask 57344  }
  0x91   :  { %v146_v49 = vpack.c.bf16 %v140_v47, %v140_v47  ;;  %v152_v51 = vld [vmem:[#allocation6 + $0x8] sm:$0xff]  ;;  %v2723_v52 = vld [vmem:[#allocation8 + $0xc4] ss:$8 sps:$4 sm:$0xff]   ;;  %v2727_v55 = vld [vmem:[#allocation8 + $0xc0] ss:$8 sps:$4 sm:$0xff]  }
  0x92   :  { %760 = vmatpush1.bf16.msra.mxu0 %v2679_v19  ;;  %v2725_v53 = vld [vmem:[#allocation9 + $0xc4] ss:$8 sps:$4 sm:$0xff]   ;;  %v158_v54 = vpack.c.bf16 %v152_v51, %v152_v51  ;;  %v2728_v56 = vld [vmem:[#allocation9 + $0xc0] ss:$8 sps:$4 sm:$0xff]   ;;  %v2731_v58 = vld [vmem:[#allocation9 + $0xd4] ss:$8 sps:$4 sm:$0xff]  }
  0x93   :  { %1473 = vmatpush1.bf16.msra.mxu1 %v2680_v20  ;;  %761 = vmatprep.subr.bf16.mxu0 %v2681_v21  ;;  %v2733_v59 = vld [vmem:[#allocation8 + $0xd0] ss:$8 sps:$4 sm:$0xff]   ;;  %v2735_v61 = vld [vmem:[#allocation8 + $0xe4] ss:$8 sps:$4 sm:$0xff]   ;;  %v2739_v63 = vld [vmem:[#allocation8 + $0xe0] ss:$8 sps:$4 sm:$0xff]  }
  0x94   :  { %1474 = vmatprep.subr.bf16.mxu1 %v2683_v22  ;;  %783 = vmatprep.mubr.bf16.mxu0 %v146_v49  ;;  %v2734_v60 = vld [vmem:[#allocation9 + $0xd0] ss:$8 sps:$4 sm:$0xff]   ;;  %v2737_v62 = vld [vmem:[#allocation9 + $0xe4] ss:$8 sps:$4 sm:$0xff]   ;;  %v2740_v0 = vld [vmem:[#allocation9 + $0xe0] ss:$8 sps:$4 sm:$0xff]  }
  0x95   :  { %1496 = vmatprep.mubr.bf16.mxu1 %v158_v54  ;;  %v2741_v1 = vld [vmem:[#allocation8 + $0xf4] ss:$8 sps:$4 sm:$0xff]   ;;  %v2745_v3 = vld [vmem:[#allocation8 + $0xf0] ss:$8 sps:$4 sm:$0xff]   ;;  %v2749_v5 = vld [vmem:[#allocation8 + $0x104] ss:$8 sps:$4 sm:$0xff]  }
  0x96   :  { %762 = vmatpush1.bf16.msra.mxu0 %v2685_v23  ;;  %v2743_v2 = vld [vmem:[#allocation9 + $0xf4] ss:$8 sps:$4 sm:$0xff]   ;;  %v2746_v4 = vld [vmem:[#allocation9 + $0xf0] ss:$8 sps:$4 sm:$0xff]   ;;  %v139_v6 = vld [vmem:[#allocation3] sm:$0xff] }
  0x97   :  { %1475 = vmatpush1.bf16.msra.mxu1 %v2686_v24  ;;  %763 = vmatprep.subr.bf16.mxu0 %v2687_v25  ;;  %v151_v7 = vld [vmem:[#allocation6] sm:$0xff]  ;;  %v2752_v8 = vld [vmem:[#allocation9 + $0x104] ss:$8 sps:$4 sm:$0xff]   ;;  %v2747_v9 = vld [vmem:[#allocation8 + $0x100] ss:$8 sps:$4 sm:$0xff]   ;;  %v145_v11 = vpack.c.bf16 %v139_v6, %v139_v6 }
  0x98   :  { %1476 = vmatprep.subr.bf16.mxu1 %v2689_v26  ;;  %v2750_v10 = vld [vmem:[#allocation9 + $0x100] ss:$8 sps:$4 sm:$0xff]   ;;  %v157_v12 = vpack.c.bf16 %v151_v7, %v151_v7  ;;  %v2755_v13 = vld [vmem:[#allocation8 + $0x114] ss:$8 sps:$4 sm:$0xff]   ;;  %v2753_v15 = vld [vmem:[#allocation8 + $0x110] ss:$8 sps:$4 sm:$0xff]  }
  0x99   :  { %v2758_v14 = vld [vmem:[#allocation9 + $0x114] ss:$8 sps:$4 sm:$0xff]   ;;  %v2756_v16 = vld [vmem:[#allocation9 + $0x110] ss:$8 sps:$4 sm:$0xff]   ;;  %v2761_v17 = vld [vmem:[#allocation8 + $0x124] ss:$8 sps:$4 sm:$0xff]  }
  0x9a   :  { %764 = vmatpush1.bf16.msra.mxu0 %v2691_v27  ;;  %v2764_v18 = vld [vmem:[#allocation9 + $0x124] ss:$8 sps:$4 sm:$0xff]   ;;  %v2759_v19 = vld [vmem:[#allocation8 + $0x120] ss:$8 sps:$4 sm:$0xff]   ;;  %v2767_v21 = vld [vmem:[#allocation8 + $0x134] ss:$8 sps:$4 sm:$0xff]  }
  0x9b   :  { %1477 = vmatpush1.bf16.msra.mxu1 %v2692_v28  ;;  %765 = vmatprep.subr.bf16.mxu0 %v2693_v29  ;;  %v2762_v20 = vld [vmem:[#allocation9 + $0x120] ss:$8 sps:$4 sm:$0xff]   ;;  %v2770_v22 = vld [vmem:[#allocation9 + $0x134] ss:$8 sps:$4 sm:$0xff]   ;;  %v2765_v23 = vld [vmem:[#allocation8 + $0x130] ss:$8 sps:$4 sm:$0xff]  }
  0x9c   :  { %1478 = vmatprep.subr.bf16.mxu1 %v2695_v30  ;;  %v2768_v24 = vld [vmem:[#allocation9 + $0x130] ss:$8 sps:$4 sm:$0xff]   ;;  %v2773_v25 = vld [vmem:[#allocation8 + $0x144] ss:$8 sps:$4 sm:$0xff]   ;;  %v2771_v27 = vld [vmem:[#allocation8 + $0x140] ss:$8 sps:$4 sm:$0xff]  }
  0x9d   :  { %v2776_v26 = vld [vmem:[#allocation9 + $0x144] ss:$8 sps:$4 sm:$0xff]   ;;  %v2774_v28 = vld [vmem:[#allocation9 + $0x140] ss:$8 sps:$4 sm:$0xff]   ;;  %v2779_v29 = vld [vmem:[#allocation8 + $0x154] ss:$8 sps:$4 sm:$0xff]  }
  0x9e   :  { %766 = vmatpush1.bf16.msra.mxu0 %v2697_v31  ;;  %v2782_v30 = vld [vmem:[#allocation9 + $0x154] ss:$8 sps:$4 sm:$0xff]   ;;  %v2777_v31 = vld [vmem:[#allocation8 + $0x150] ss:$8 sps:$4 sm:$0xff]   ;;  %v2795_v47 = vld [vmem:[#allocation8 + $0x180] ss:$8 sps:$4 sm:$0xff]  }
  0x9f   :  { %1479 = vmatpush1.bf16.msra.mxu1 %v2698_v32  ;;  %767 = vmatprep.subr.bf16.mxu0 %v2699_v33  ;;  %v2780_v32 = vld [vmem:[#allocation9 + $0x150] ss:$8 sps:$4 sm:$0xff]   ;;  %v2785_v33 = vld [vmem:[#allocation8 + $0x164] ss:$8 sps:$4 sm:$0xff]   ;;  %v2803_v49 = vld [vmem:[#allocation8 + $0x194] ss:$8 sps:$4 sm:$0xff]  }
  0xa0   :  { %1480 = vmatprep.subr.bf16.mxu1 %v2701_v34  ;;  %v2788_v34 = vld [vmem:[#allocation9 + $0x164] ss:$8 sps:$4 sm:$0xff]   ;;  %v2801_v51 = vld [vmem:[#allocation8 + $0x190] ss:$8 sps:$4 sm:$0xff]   ;;  %v2831_v7 = vld [vmem:[#allocation8 + $0x1e0] ss:$8 sps:$4 sm:$0xff]  }
  0xa1   :  { %v2812_v54 = vld [vmem:[#allocation9 + $0x1a4] ss:$8 sps:$4 sm:$0xff]  }
  0xa2   :  { %768 = vmatpush1.bf16.msra.mxu0 %v2703_v35  ;;  %v142_v35 = vld [vmem:[#allocation3 + $0x18] sm:$0xff]  ;;  %v2836_v6 = vld [vmem:[#allocation9 + $0x1e4] ss:$8 sps:$4 sm:$0xff]  }
  0xa3   :  { %1481 = vmatpush1.bf16.msra.mxu1 %v2704_v36  ;;  %769 = vmatprep.subr.bf16.mxu0 %v2705_v37  ;;  %v2783_v36 = vld [vmem:[#allocation8 + $0x160] ss:$8 sps:$4 sm:$0xff]   ;;  %v148_v37 = vpack.c.bf16 %v142_v35, %v142_v35  ;;  %v2861_v35 = vld [vmem:[#allocation8 + $0x230] ss:$8 sps:$4 sm:$0xff]  }
  0xa4   :  { %1482 = vmatprep.subr.bf16.mxu1 %v2707_v38  ;;  %v2786_v38 = vld [vmem:[#allocation9 + $0x160] ss:$8 sps:$4 sm:$0xff]  }
  0xa6   :  { %770 = vmatpush1.bf16.msra.mxu0 %v2709_v39  ;;  %v154_v39 = vld [vmem:[#allocation6 + $0x18] sm:$0xff] }
  0xa7   :  { %1483 = vmatpush1.bf16.msra.mxu1 %v2710_v40  ;;  %771 = vmatprep.subr.bf16.mxu0 %v2711_v41  ;;  %v2791_v40 = vld [vmem:[#allocation8 + $0x174] ss:$8 sps:$4 sm:$0xff]  }
  0xa8   :  { %1484 = vmatprep.subr.bf16.mxu1 %v2713_v42  ;;  %v2794_v41 = vld [vmem:[#allocation9 + $0x174] ss:$8 sps:$4 sm:$0xff]   ;;  %v160_v42 = vpack.c.bf16 %v154_v39, %v154_v39  ;;  %v2867_v39 = vld [vmem:[#allocation8 + $0x240] ss:$8 sps:$4 sm:$0xff]  }
  0xaa   :  { %772 = vmatpush1.bf16.msra.mxu0 %v2715_v43  ;;  %v2789_v43 = vld [vmem:[#allocation8 + $0x170] ss:$8 sps:$4 sm:$0xff]  }
  0xab   :  { %1485 = vmatpush1.bf16.msra.mxu1 %v2716_v44  ;;  %773 = vmatprep.subr.bf16.mxu0 %v2717_v45  ;;  %v2792_v44 = vld [vmem:[#allocation9 + $0x170] ss:$8 sps:$4 sm:$0xff]   ;;  %v2797_v45 = vld [vmem:[#allocation8 + $0x184] ss:$8 sps:$4 sm:$0xff]  }
  0xac   :  { %1486 = vmatprep.subr.bf16.mxu1 %v2719_v46  ;;  %v2800_v46 = vld [vmem:[#allocation9 + $0x184] ss:$8 sps:$4 sm:$0xff]  }
  0xae   :  { %774 = vmatpush1.bf16.msra.mxu0 %v2721_v48  ;;  %v2798_v48 = vld [vmem:[#allocation9 + $0x180] ss:$8 sps:$4 sm:$0xff]  }
  0xaf   :  { %1487 = vmatpush1.bf16.msra.mxu1 %v2722_v50  ;;  %775 = vmatprep.subr.bf16.mxu0 %v2723_v52  ;;  %v2806_v50 = vld [vmem:[#allocation9 + $0x194] ss:$8 sps:$4 sm:$0xff]   ;;  %v2804_v52 = vld [vmem:[#allocation9 + $0x190] ss:$8 sps:$4 sm:$0xff]  }
  0xb0   :  { %1488 = vmatprep.subr.bf16.mxu1 %v2725_v53  ;;  %v2809_v53 = vld [vmem:[#allocation8 + $0x1a4] ss:$8 sps:$4 sm:$0xff]  }
  0xb2   :  { %776 = vmatpush1.bf16.msra.mxu0 %v2727_v55  ;;  %v2807_v55 = vld [vmem:[#allocation8 + $0x1a0] ss:$8 sps:$4 sm:$0xff]  }
  0xb3   :  { %1489 = vmatpush1.bf16.msra.mxu1 %v2728_v56  ;;  %777 = vmatprep.subr.bf16.mxu0 %v2729_v57  ;;  %v2810_v56 = vld [vmem:[#allocation9 + $0x1a0] ss:$8 sps:$4 sm:$0xff]   ;;  %v2815_v57 = vld [vmem:[#allocation8 + $0x1b4] ss:$8 sps:$4 sm:$0xff]  }
  0xb4   :  { %1490 = vmatprep.subr.bf16.mxu1 %v2731_v58  ;;  %v2818_v58 = vld [vmem:[#allocation9 + $0x1b4] ss:$8 sps:$4 sm:$0xff]  }
  0xb6   :  { %778 = vmatpush1.bf16.msra.mxu0 %v2733_v59  ;;  %v2813_v59 = vld [vmem:[#allocation8 + $0x1b0] ss:$8 sps:$4 sm:$0xff]  }
  0xb7   :  { %1491 = vmatpush1.bf16.msra.mxu1 %v2734_v60  ;;  %779 = vmatprep.subr.bf16.mxu0 %v2735_v61  ;;  %v2816_v60 = vld [vmem:[#allocation9 + $0x1b0] ss:$8 sps:$4 sm:$0xff]   ;;  %v2821_v61 = vld [vmem:[#allocation8 + $0x1c4] ss:$8 sps:$4 sm:$0xff]  }
  0xb8   :  { %1492 = vmatprep.subr.bf16.mxu1 %v2737_v62  ;;  %v2824_v62 = vld [vmem:[#allocation9 + $0x1c4] ss:$8 sps:$4 sm:$0xff]  }
  0xba   :  { %780 = vmatpush1.bf16.msra.mxu0 %v2739_v63  ;;  %v2819_v63 = vld [vmem:[#allocation8 + $0x1c0] ss:$8 sps:$4 sm:$0xff]  }
  0xbb   :  { %1493 = vmatpush1.bf16.msra.mxu1 %v2740_v0  ;;  %781 = vmatprep.subr.bf16.mxu0 %v2741_v1  ;;  %v2822_v0 = vld [vmem:[#allocation9 + $0x1c0] ss:$8 sps:$4 sm:$0xff]   ;;  %v2827_v1 = vld [vmem:[#allocation8 + $0x1d4] ss:$8 sps:$4 sm:$0xff]  }
  0xbc   :  { %1494 = vmatprep.subr.bf16.mxu1 %v2743_v2  ;;  %v2830_v2 = vld [vmem:[#allocation9 + $0x1d4] ss:$8 sps:$4 sm:$0xff]  }
  0xbe   :  { %782 = vmatpush1.bf16.msra.mxu0 %v2745_v3  ;;  %v2825_v3 = vld [vmem:[#allocation8 + $0x1d0] ss:$8 sps:$4 sm:$0xff]  }
  0xbf   :  { %1495 = vmatpush1.bf16.msra.mxu1 %v2746_v4  ;;  %792 = vmatprep.subr.bf16.mxu0 %v2749_v5  ;;  %v2828_v4 = vld [vmem:[#allocation9 + $0x1d0] ss:$8 sps:$4 sm:$0xff]   ;;  %v2833_v5 = vld [vmem:[#allocation8 + $0x1e4] ss:$8 sps:$4 sm:$0xff]  }
  0xc0   :  { %1505 = vmatprep.subr.bf16.mxu1 %v2752_v8  ;;  %v2834_v8 = vld [vmem:[#allocation9 + $0x1e0] ss:$8 sps:$4 sm:$0xff]  }
  0xc1   :  { %784 = vmatmul.mubr.bf16.vlgmr.msra.gmra.mrb[0].mxu0 %v145_v11  ;;  %v2837_v11 = vld [vmem:[#allocation8 + $0x1f0] ss:$8 sps:$4 sm:$0xff]  }
  0xc2   :  { %1497 = vmatmul.mubr.bf16.vlgmr.msra.gmra.mrb[0].mxu1 %v157_v12  ;;  %793 = vmatpush1.bf16.msra.mxu0 %v2747_v9  ;;  %v2839_v9 = vld [vmem:[#allocation8 + $0x1f4] ss:$8 sps:$4 sm:$0xff]   ;;  %v2840_v12 = vld [vmem:[#allocation9 + $0x1f0] ss:$8 sps:$4 sm:$0xff]  }
  0xc3   :  { %1506 = vmatpush1.bf16.msra.mxu1 %v2750_v10  ;;  %794 = vmatprep.subr.bf16.mxu0 %v2755_v13  ;;  %v2842_v10 = vld [vmem:[#allocation9 + $0x1f4] ss:$8 sps:$4 sm:$0xff]   ;;  %v2845_v13 = vld [vmem:[#allocation8 + $0x204] ss:$8 sps:$4 sm:$0xff]  }
  0xc4   :  { %1507 = vmatprep.subr.bf16.mxu1 %v2758_v14  ;;  %824 = vmatprep.mubr.bf16.mxu0 %v148_v37  ;;  %v141_v14 = vld [vmem:[#allocation3 + $0x10] sm:$0xff]  ;;  %v2869_v37 = vld [vmem:[#allocation8 + $0x244] ss:$8 sps:$4 sm:$0xff]  }
  0xc5   :  { %1537 = vmatprep.mubr.bf16.mxu1 %v160_v42  ;;  %v2878_v42 = vld [vmem:[#allocation9 + $0x254] ss:$8 sps:$4 sm:$0xff]  }
  0xc6   :  { %795 = vmatpush1.bf16.msra.mxu0 %v2753_v15  ;;  %v153_v15 = vld [vmem:[#allocation6 + $0x10] sm:$0xff] }
  0xc7   :  { %1508 = vmatpush1.bf16.msra.mxu1 %v2756_v16  ;;  %796 = vmatprep.subr.bf16.mxu0 %v2761_v17  ;;  %v2848_v16 = vld [vmem:[#allocation9 + $0x204] ss:$8 sps:$4 sm:$0xff]   ;;  %v2843_v17 = vld [vmem:[#allocation8 + $0x200] ss:$8 sps:$4 sm:$0xff]  }
  0xc8   :  { %1509 = vmatprep.subr.bf16.mxu1 %v2764_v18  ;;  %v2846_v18 = vld [vmem:[#allocation9 + $0x200] ss:$8 sps:$4 sm:$0xff]  }
  0xca   :  { %797 = vmatpush1.bf16.msra.mxu0 %v2759_v19  ;;  %v147_v19 = vpack.c.bf16 %v141_v14, %v141_v14  ;;  %v2932_v14 = vld [vmem:[#allocation9 + $0x2e4] ss:$8 sps:$4 sm:$0xff]  }
  0xcb   :  { %1510 = vmatpush1.bf16.msra.mxu1 %v2762_v20  ;;  %798 = vmatprep.subr.bf16.mxu0 %v2767_v21  ;;  %v159_v20 = vpack.c.bf16 %v153_v15, %v153_v15  ;;  %v2851_v21 = vld [vmem:[#allocation8 + $0x214] ss:$8 sps:$4 sm:$0xff]   ;;  %v2927_v15 = vld [vmem:[#allocation8 + $0x2e0] ss:$8 sps:$4 sm:$0xff]  }
  0xcc   :  { %1511 = vmatprep.subr.bf16.mxu1 %v2770_v22  ;;  %v2854_v22 = vld [vmem:[#allocation9 + $0x214] ss:$8 sps:$4 sm:$0xff]  }
  0xce   :  { %799 = vmatpush1.bf16.msra.mxu0 %v2765_v23  ;;  %v144_v23 = vld [vmem:[#allocation3 + $0x28] sm:$0xff] }
  0xcf   :  { %1512 = vmatpush1.bf16.msra.mxu1 %v2768_v24  ;;  %800 = vmatprep.subr.bf16.mxu0 %v2773_v25  ;;  %v2849_v24 = vld [vmem:[#allocation8 + $0x210] ss:$8 sps:$4 sm:$0xff]  }
  0xd0   :  { %1513 = vmatprep.subr.bf16.mxu1 %v2776_v26  ;;  %v2852_v25 = vld [vmem:[#allocation9 + $0x210] ss:$8 sps:$4 sm:$0xff]   ;;  %v150_v26 = vpack.c.bf16 %v144_v23, %v144_v23  ;;  %v2941_v23 = vld [vmem:[#allocation12 + $0x4] ss:$8 sps:$4 sm:$0xff]  }
  0xd2   :  { %801 = vmatpush1.bf16.msra.mxu0 %v2771_v27  ;;  %v156_v27 = vld [vmem:[#allocation6 + $0x28] sm:$0xff] }
  0xd3   :  { %1514 = vmatpush1.bf16.msra.mxu1 %v2774_v28  ;;  %802 = vmatprep.subr.bf16.mxu0 %v2779_v29  ;;  %v2857_v28 = vld [vmem:[#allocation8 + $0x224] ss:$8 sps:$4 sm:$0xff]   ;;  %v162_v29 = vpack.c.bf16 %v156_v27, %v156_v27  ;;  %v2939_v27 = vld [vmem:[#allocation12] ss:$8 sps:$4 sm:$0xff]  }
  0xd4   :  { %1515 = vmatprep.subr.bf16.mxu1 %v2782_v30  ;;  %v2860_v30 = vld [vmem:[#allocation9 + $0x224] ss:$8 sps:$4 sm:$0xff]  }
  0xd6   :  { %803 = vmatpush1.bf16.msra.mxu0 %v2777_v31  ;;  %v2855_v31 = vld [vmem:[#allocation8 + $0x220] ss:$8 sps:$4 sm:$0xff]  }
  0xd7   :  { %1516 = vmatpush1.bf16.msra.mxu1 %v2780_v32  ;;  %804 = vmatprep.subr.bf16.mxu0 %v2785_v33  ;;  %v2858_v32 = vld [vmem:[#allocation9 + $0x220] ss:$8 sps:$4 sm:$0xff]   ;;  %v2863_v33 = vld [vmem:[#allocation8 + $0x234] ss:$8 sps:$4 sm:$0xff]  }
  0xd8   :  { %1517 = vmatprep.subr.bf16.mxu1 %v2788_v34  ;;  %v2866_v34 = vld [vmem:[#allocation9 + $0x234] ss:$8 sps:$4 sm:$0xff]  }
  0xda   :  { %805 = vmatpush1.bf16.msra.mxu0 %v2783_v36  ;;  %v2864_v36 = vld [vmem:[#allocation9 + $0x230] ss:$8 sps:$4 sm:$0xff]  }
  0xdb   :  { %1518 = vmatpush1.bf16.msra.mxu1 %v2786_v38  ;;  %806 = vmatprep.subr.bf16.mxu0 %v2791_v40  ;;  %v2872_v38 = vld [vmem:[#allocation9 + $0x244] ss:$8 sps:$4 sm:$0xff]   ;;  %v2870_v40 = vld [vmem:[#allocation9 + $0x240] ss:$8 sps:$4 sm:$0xff]  }
  0xdc   :  { %1519 = vmatprep.subr.bf16.mxu1 %v2794_v41  ;;  %v2875_v41 = vld [vmem:[#allocation8 + $0x254] ss:$8 sps:$4 sm:$0xff]  }
  0xde   :  { %807 = vmatpush1.bf16.msra.mxu0 %v2789_v43  ;;  %v2873_v43 = vld [vmem:[#allocation8 + $0x250] ss:$8 sps:$4 sm:$0xff]  }
  0xdf   :  { %1520 = vmatpush1.bf16.msra.mxu1 %v2792_v44  ;;  %808 = vmatprep.subr.bf16.mxu0 %v2797_v45  ;;  %v2876_v44 = vld [vmem:[#allocation9 + $0x250] ss:$8 sps:$4 sm:$0xff]   ;;  %v2881_v45 = vld [vmem:[#allocation8 + $0x264] ss:$8 sps:$4 sm:$0xff]  }
  0xe0   :  { %1521 = vmatprep.subr.bf16.mxu1 %v2800_v46  ;;  %v2884_v46 = vld [vmem:[#allocation9 + $0x264] ss:$8 sps:$4 sm:$0xff]  }
  0xe2   :  { %809 = vmatpush1.bf16.msra.mxu0 %v2795_v47  ;;  %v2879_v47 = vld [vmem:[#allocation8 + $0x260] ss:$8 sps:$4 sm:$0xff]  }
  0xe3   :  { %1522 = vmatpush1.bf16.msra.mxu1 %v2798_v48  ;;  %810 = vmatprep.subr.bf16.mxu0 %v2803_v49  ;;  %v2882_v48 = vld [vmem:[#allocation9 + $0x260] ss:$8 sps:$4 sm:$0xff]   ;;  %v2887_v49 = vld [vmem:[#allocation8 + $0x274] ss:$8 sps:$4 sm:$0xff]  }
  0xe4   :  { %1523 = vmatprep.subr.bf16.mxu1 %v2806_v50  ;;  %v2890_v50 = vld [vmem:[#allocation9 + $0x274] ss:$8 sps:$4 sm:$0xff]  }
  0xe6   :  { %811 = vmatpush1.bf16.msra.mxu0 %v2801_v51  ;;  %v2885_v51 = vld [vmem:[#allocation8 + $0x270] ss:$8 sps:$4 sm:$0xff]  }
  0xe7   :  { %1524 = vmatpush1.bf16.msra.mxu1 %v2804_v52  ;;  %812 = vmatprep.subr.bf16.mxu0 %v2809_v53  ;;  %v2888_v52 = vld [vmem:[#allocation9 + $0x270] ss:$8 sps:$4 sm:$0xff]   ;;  %v2893_v53 = vld [vmem:[#allocation8 + $0x284] ss:$8 sps:$4 sm:$0xff]  }
  0xe8   :  { %1525 = vmatprep.subr.bf16.mxu1 %v2812_v54  ;;  %v2896_v54 = vld [vmem:[#allocation9 + $0x284] ss:$8 sps:$4 sm:$0xff]  }
  0xea   :  { %813 = vmatpush1.bf16.msra.mxu0 %v2807_v55  ;;  %v2891_v55 = vld [vmem:[#allocation8 + $0x280] ss:$8 sps:$4 sm:$0xff]  }
  0xeb   :  { %1526 = vmatpush1.bf16.msra.mxu1 %v2810_v56  ;;  %814 = vmatprep.subr.bf16.mxu0 %v2815_v57  ;;  %v2894_v56 = vld [vmem:[#allocation9 + $0x280] ss:$8 sps:$4 sm:$0xff]   ;;  %v2899_v57 = vld [vmem:[#allocation8 + $0x294] ss:$8 sps:$4 sm:$0xff]  }
  0xec   :  { %1527 = vmatprep.subr.bf16.mxu1 %v2818_v58  ;;  %v2902_v58 = vld [vmem:[#allocation9 + $0x294] ss:$8 sps:$4 sm:$0xff]  }
  0xee   :  { %815 = vmatpush1.bf16.msra.mxu0 %v2813_v59  ;;  %v2897_v59 = vld [vmem:[#allocation8 + $0x290] ss:$8 sps:$4 sm:$0xff]  }
  0xef   :  { %1528 = vmatpush1.bf16.msra.mxu1 %v2816_v60  ;;  %816 = vmatprep.subr.bf16.mxu0 %v2821_v61  ;;  %v2900_v60 = vld [vmem:[#allocation9 + $0x290] ss:$8 sps:$4 sm:$0xff]   ;;  %v2905_v61 = vld [vmem:[#allocation8 + $0x2a4] ss:$8 sps:$4 sm:$0xff]  }
  0xf0   :  { %1529 = vmatprep.subr.bf16.mxu1 %v2824_v62  ;;  %v2908_v62 = vld [vmem:[#allocation9 + $0x2a4] ss:$8 sps:$4 sm:$0xff]  }
  0xf2   :  { %817 = vmatpush1.bf16.msra.mxu0 %v2819_v63  ;;  %v2903_v63 = vld [vmem:[#allocation8 + $0x2a0] ss:$8 sps:$4 sm:$0xff]  }
  0xf3   :  { %1530 = vmatpush1.bf16.msra.mxu1 %v2822_v0  ;;  %818 = vmatprep.subr.bf16.mxu0 %v2827_v1  ;;  %v2906_v0 = vld [vmem:[#allocation9 + $0x2a0] ss:$8 sps:$4 sm:$0xff]   ;;  %v2911_v1 = vld [vmem:[#allocation8 + $0x2b4] ss:$8 sps:$4 sm:$0xff]  }
  0xf4   :  { %1531 = vmatprep.subr.bf16.mxu1 %v2830_v2  ;;  %v2914_v2 = vld [vmem:[#allocation9 + $0x2b4] ss:$8 sps:$4 sm:$0xff]  }
  0xf6   :  { %819 = vmatpush1.bf16.msra.mxu0 %v2825_v3  ;;  %v2909_v3 = vld [vmem:[#allocation8 + $0x2b0] ss:$8 sps:$4 sm:$0xff]  }
  0xf7   :  { %1532 = vmatpush1.bf16.msra.mxu1 %v2828_v4  ;;  %820 = vmatprep.subr.bf16.mxu0 %v2833_v5  ;;  %v2912_v4 = vld [vmem:[#allocation9 + $0x2b0] ss:$8 sps:$4 sm:$0xff]   ;;  %v2917_v5 = vld [vmem:[#allocation8 + $0x2c4] ss:$8 sps:$4 sm:$0xff]  }
  0xf8   :  { %1533 = vmatprep.subr.bf16.mxu1 %v2836_v6  ;;  %v2920_v6 = vld [vmem:[#allocation9 + $0x2c4] ss:$8 sps:$4 sm:$0xff]  }
  0xfa   :  { %821 = vmatpush1.bf16.msra.mxu0 %v2831_v7  ;;  %v2915_v7 = vld [vmem:[#allocation8 + $0x2c0] ss:$8 sps:$4 sm:$0xff]  }
  0xfb   :  { %1534 = vmatpush1.bf16.msra.mxu1 %v2834_v8  ;;  %822 = vmatprep.subr.bf16.mxu0 %v2839_v9  ;;  %v2918_v8 = vld [vmem:[#allocation9 + $0x2c0] ss:$8 sps:$4 sm:$0xff]   ;;  %v2923_v9 = vld [vmem:[#allocation8 + $0x2d4] ss:$8 sps:$4 sm:$0xff]  }
  0xfc   :  { %1535 = vmatprep.subr.bf16.mxu1 %v2842_v10  ;;  %v2926_v10 = vld [vmem:[#allocation9 + $0x2d4] ss:$8 sps:$4 sm:$0xff]  }
  0xfe   :  { %823 = vmatpush1.bf16.msra.mxu0 %v2837_v11  ;;  %v2921_v11 = vld [vmem:[#allocation8 + $0x2d0] ss:$8 sps:$4 sm:$0xff]  }
  0xff   :  { %1536 = vmatpush1.bf16.msra.mxu1 %v2840_v12  ;;  %833 = vmatprep.subr.bf16.mxu0 %v2845_v13  ;;  %v2924_v12 = vld [vmem:[#allocation9 + $0x2d0] ss:$8 sps:$4 sm:$0xff]   ;;  %v2929_v13 = vld [vmem:[#allocation8 + $0x2e4] ss:$8 sps:$4 sm:$0xff]  }
 0x100   :  { %1546 = vmatprep.subr.bf16.mxu1 %v2848_v16  ;;  %v2930_v16 = vld [vmem:[#allocation9 + $0x2e0] ss:$8 sps:$4 sm:$0xff]  }
 0x101   :  { %825 = vmatmul.mubr.bf16.vlgmr.msra.gmra.mrb[0].mxu0 %v147_v19  ;;  %v2933_v19 = vld [vmem:[#allocation8 + $0x2f0] ss:$8 sps:$4 sm:$0xff]  }
 0x102   :  { %1538 = vmatmul.mubr.bf16.vlgmr.msra.gmra.mrb[0].mxu1 %v159_v20  ;;  %834 = vmatpush1.bf16.msra.mxu0 %v2843_v17  ;;  %v2935_v17 = vld [vmem:[#allocation8 + $0x2f4] ss:$8 sps:$4 sm:$0xff]   ;;  %v2936_v20 = vld [vmem:[#allocation9 + $0x2f0] ss:$8 sps:$4 sm:$0xff]  }
 0x103   :  { %1547 = vmatpush1.bf16.msra.mxu1 %v2846_v18  ;;  %835 = vmatprep.subr.bf16.mxu0 %v2851_v21  ;;  %v2938_v18 = vld [vmem:[#allocation9 + $0x2f4] ss:$8 sps:$4 sm:$0xff]   ;;  %v143_v21 = vld [vmem:[#allocation3 + $0x20] sm:$0xff] }
 0x104   :  { %1548 = vmatprep.subr.bf16.mxu1 %v2854_v22  ;;  %865 = vmatprep.mubr.bf16.mxu0 %v150_v26  ;;  %v155_v22 = vld [vmem:[#allocation6 + $0x20] sm:$0xff] }
 0x105   :  { %1578 = vmatprep.mubr.bf16.mxu1 %v162_v29  ;;  %v161_v26 = vpack.c.bf16 %v155_v22, %v155_v22  ;;  %v2947_v29 = vld [vmem:[#allocation12 + $0x14] ss:$8 sps:$4 sm:$0xff]  }
 0x106   :  { %836 = vmatpush1.bf16.msra.mxu0 %v2849_v24  ;;  %v2944_v24 = vld [vmem:[#allocation11 + $0x4] ss:$8 sps:$4 sm:$0xff]   ;;  %v3034_v22 = vld [vmem:[#allocation11 + $0xf4] ss:$8 sps:$4 sm:$0xff]  }
 0x107   :  { %1549 = vmatpush1.bf16.msra.mxu1 %v2852_v25  ;;  %837 = vmatprep.subr.bf16.mxu0 %v2857_v28  ;;  %v149_v25 = vpack.c.bf16 %v143_v21, %v143_v21  ;;  %v2942_v28 = vld [vmem:[#allocation11] ss:$8 sps:$4 sm:$0xff]   ;;  %v3031_v21 = vld [vmem:[#allocation12 + $0xf4] ss:$8 sps:$4 sm:$0xff]  }
 0x108   :  { %1550 = vmatprep.subr.bf16.mxu1 %v2860_v30  ;;  %v2950_v30 = vld [vmem:[#allocation11 + $0x14] ss:$8 sps:$4 sm:$0xff]  }
 0x10a   :  { %838 = vmatpush1.bf16.msra.mxu0 %v2855_v31  ;;  %v2945_v31 = vld [vmem:[#allocation12 + $0x10] ss:$8 sps:$4 sm:$0xff]  }
 0x10b   :  { %1551 = vmatpush1.bf16.msra.mxu1 %v2858_v32  ;;  %839 = vmatprep.subr.bf16.mxu0 %v2863_v33  ;;  %v2948_v32 = vld [vmem:[#allocation11 + $0x10] ss:$8 sps:$4 sm:$0xff]   ;;  %v2953_v33 = vld [vmem:[#allocation12 + $0x24] ss:$8 sps:$4 sm:$0xff]  }
 0x10c   :  { %1552 = vmatprep.subr.bf16.mxu1 %v2866_v34  ;;  %v2956_v34 = vld [vmem:[#allocation11 + $0x24] ss:$8 sps:$4 sm:$0xff]  }
 0x10e   :  { %840 = vmatpush1.bf16.msra.mxu0 %v2861_v35  ;;  %v2951_v35 = vld [vmem:[#allocation12 + $0x20] ss:$8 sps:$4 sm:$0xff]  }
 0x10f   :  { %1553 = vmatpush1.bf16.msra.mxu1 %v2864_v36  ;;  %841 = vmatprep.subr.bf16.mxu0 %v2869_v37  ;;  %v2954_v36 = vld [vmem:[#allocation11 + $0x20] ss:$8 sps:$4 sm:$0xff]   ;;  %v2959_v37 = vld [vmem:[#allocation12 + $0x34] ss:$8 sps:$4 sm:$0xff]  }
 0x110   :  { %1554 = vmatprep.subr.bf16.mxu1 %v2872_v38  ;;  %v2962_v38 = vld [vmem:[#allocation11 + $0x34] ss:$8 sps:$4 sm:$0xff]  }
 0x112   :  { %842 = vmatpush1.bf16.msra.mxu0 %v2867_v39  ;;  %v2957_v39 = vld [vmem:[#allocation12 + $0x30] ss:$8 sps:$4 sm:$0xff]  }
 0x113   :  { %1555 = vmatpush1.bf16.msra.mxu1 %v2870_v40  ;;  %843 = vmatprep.subr.bf16.mxu0 %v2875_v41  ;;  %v2960_v40 = vld [vmem:[#allocation11 + $0x30] ss:$8 sps:$4 sm:$0xff]   ;;  %v2965_v41 = vld [vmem:[#allocation12 + $0x44] ss:$8 sps:$4 sm:$0xff]  }
 0x114   :  { %1556 = vmatprep.subr.bf16.mxu1 %v2878_v42  ;;  %v2968_v42 = vld [vmem:[#allocation11 + $0x44] ss:$8 sps:$4 sm:$0xff]  }
 0x116   :  { %844 = vmatpush1.bf16.msra.mxu0 %v2873_v43  ;;  %v2963_v43 = vld [vmem:[#allocation12 + $0x40] ss:$8 sps:$4 sm:$0xff]  }
 0x117   :  { %1557 = vmatpush1.bf16.msra.mxu1 %v2876_v44  ;;  %845 = vmatprep.subr.bf16.mxu0 %v2881_v45  ;;  %v2966_v44 = vld [vmem:[#allocation11 + $0x40] ss:$8 sps:$4 sm:$0xff]   ;;  %v2971_v45 = vld [vmem:[#allocation12 + $0x54] ss:$8 sps:$4 sm:$0xff]  }
 0x118   :  { %1558 = vmatprep.subr.bf16.mxu1 %v2884_v46  ;;  %v2974_v46 = vld [vmem:[#allocation11 + $0x54] ss:$8 sps:$4 sm:$0xff]  }
 0x11a   :  { %846 = vmatpush1.bf16.msra.mxu0 %v2879_v47  ;;  %v2969_v47 = vld [vmem:[#allocation12 + $0x50] ss:$8 sps:$4 sm:$0xff]  }
 0x11b   :  { %1559 = vmatpush1.bf16.msra.mxu1 %v2882_v48  ;;  %847 = vmatprep.subr.bf16.mxu0 %v2887_v49  ;;  %v2972_v48 = vld [vmem:[#allocation11 + $0x50] ss:$8 sps:$4 sm:$0xff]   ;;  %v2977_v49 = vld [vmem:[#allocation12 + $0x64] ss:$8 sps:$4 sm:$0xff]  }
 0x11c   :  { %1560 = vmatprep.subr.bf16.mxu1 %v2890_v50  ;;  %v2980_v50 = vld [vmem:[#allocation11 + $0x64] ss:$8 sps:$4 sm:$0xff]  }
 0x11e   :  { %848 = vmatpush1.bf16.msra.mxu0 %v2885_v51  ;;  %v2975_v51 = vld [vmem:[#allocation12 + $0x60] ss:$8 sps:$4 sm:$0xff]  }
 0x11f   :  { %1561 = vmatpush1.bf16.msra.mxu1 %v2888_v52  ;;  %849 = vmatprep.subr.bf16.mxu0 %v2893_v53  ;;  %v2978_v52 = vld [vmem:[#allocation11 + $0x60] ss:$8 sps:$4 sm:$0xff]   ;;  %v2983_v53 = vld [vmem:[#allocation12 + $0x74] ss:$8 sps:$4 sm:$0xff]  }
 0x120   :  { %1562 = vmatprep.subr.bf16.mxu1 %v2896_v54  ;;  %v2986_v54 = vld [vmem:[#allocation11 + $0x74] ss:$8 sps:$4 sm:$0xff]  }
 0x122   :  { %850 = vmatpush1.bf16.msra.mxu0 %v2891_v55  ;;  %v2981_v55 = vld [vmem:[#allocation12 + $0x70] ss:$8 sps:$4 sm:$0xff]  }
 0x123   :  { %1563 = vmatpush1.bf16.msra.mxu1 %v2894_v56  ;;  %851 = vmatprep.subr.bf16.mxu0 %v2899_v57  ;;  %v2984_v56 = vld [vmem:[#allocation11 + $0x70] ss:$8 sps:$4 sm:$0xff]   ;;  %v2989_v57 = vld [vmem:[#allocation12 + $0x84] ss:$8 sps:$4 sm:$0xff]  }
 0x124   :  { %1564 = vmatprep.subr.bf16.mxu1 %v2902_v58  ;;  %v2992_v58 = vld [vmem:[#allocation11 + $0x84] ss:$8 sps:$4 sm:$0xff]  }
 0x126   :  { %852 = vmatpush1.bf16.msra.mxu0 %v2897_v59  ;;  %v2987_v59 = vld [vmem:[#allocation12 + $0x80] ss:$8 sps:$4 sm:$0xff]  }
 0x127   :  { %1565 = vmatpush1.bf16.msra.mxu1 %v2900_v60  ;;  %853 = vmatprep.subr.bf16.mxu0 %v2905_v61  ;;  %v2990_v60 = vld [vmem:[#allocation11 + $0x80] ss:$8 sps:$4 sm:$0xff]   ;;  %v2995_v61 = vld [vmem:[#allocation12 + $0x94] ss:$8 sps:$4 sm:$0xff]  }
 0x128   :  { %1566 = vmatprep.subr.bf16.mxu1 %v2908_v62  ;;  %v2998_v62 = vld [vmem:[#allocation11 + $0x94] ss:$8 sps:$4 sm:$0xff]  }
 0x12a   :  { %854 = vmatpush1.bf16.msra.mxu0 %v2903_v63  ;;  %v2993_v63 = vld [vmem:[#allocation12 + $0x90] ss:$8 sps:$4 sm:$0xff]  }
 0x12b   :  { %1567 = vmatpush1.bf16.msra.mxu1 %v2906_v0  ;;  %855 = vmatprep.subr.bf16.mxu0 %v2911_v1  ;;  %v2996_v0 = vld [vmem:[#allocation11 + $0x90] ss:$8 sps:$4 sm:$0xff]   ;;  %v3001_v1 = vld [vmem:[#allocation12 + $0xa4] ss:$8 sps:$4 sm:$0xff]  }
 0x12c   :  { %1568 = vmatprep.subr.bf16.mxu1 %v2914_v2  ;;  %v3004_v2 = vld [vmem:[#allocation11 + $0xa4] ss:$8 sps:$4 sm:$0xff]  }
 0x12e   :  { %856 = vmatpush1.bf16.msra.mxu0 %v2909_v3  ;;  %v2999_v3 = vld [vmem:[#allocation12 + $0xa0] ss:$8 sps:$4 sm:$0xff]  }
 0x12f   :  { %1569 = vmatpush1.bf16.msra.mxu1 %v2912_v4  ;;  %857 = vmatprep.subr.bf16.mxu0 %v2917_v5  ;;  %v3002_v4 = vld [vmem:[#allocation11 + $0xa0] ss:$8 sps:$4 sm:$0xff]   ;;  %v3007_v5 = vld [vmem:[#allocation12 + $0xb4] ss:$8 sps:$4 sm:$0xff]  }
 0x130   :  { %1570 = vmatprep.subr.bf16.mxu1 %v2920_v6  ;;  %v3010_v6 = vld [vmem:[#allocation11 + $0xb4] ss:$8 sps:$4 sm:$0xff]  }
 0x132   :  { %858 = vmatpush1.bf16.msra.mxu0 %v2915_v7  ;;  %v3005_v7 = vld [vmem:[#allocation12 + $0xb0] ss:$8 sps:$4 sm:$0xff]  }
 0x133   :  { %1571 = vmatpush1.bf16.msra.mxu1 %v2918_v8  ;;  %859 = vmatprep.subr.bf16.mxu0 %v2923_v9  ;;  %v3008_v8 = vld [vmem:[#allocation11 + $0xb0] ss:$8 sps:$4 sm:$0xff]   ;;  %v3013_v9 = vld [vmem:[#allocation12 + $0xc4] ss:$8 sps:$4 sm:$0xff]  }
 0x134   :  { %1572 = vmatprep.subr.bf16.mxu1 %v2926_v10  ;;  %v3016_v10 = vld [vmem:[#allocation11 + $0xc4] ss:$8 sps:$4 sm:$0xff]  }
 0x136   :  { %860 = vmatpush1.bf16.msra.mxu0 %v2921_v11  ;;  %v3011_v11 = vld [vmem:[#allocation12 + $0xc0] ss:$8 sps:$4 sm:$0xff]  }
 0x137   :  { %1573 = vmatpush1.bf16.msra.mxu1 %v2924_v12  ;;  %861 = vmatprep.subr.bf16.mxu0 %v2929_v13  ;;  %v3014_v12 = vld [vmem:[#allocation11 + $0xc0] ss:$8 sps:$4 sm:$0xff]   ;;  %v3019_v13 = vld [vmem:[#allocation12 + $0xd4] ss:$8 sps:$4 sm:$0xff]  }
 0x138   :  { %1574 = vmatprep.subr.bf16.mxu1 %v2932_v14  ;;  %v3022_v14 = vld [vmem:[#allocation11 + $0xd4] ss:$8 sps:$4 sm:$0xff]  }
 0x13a   :  { %862 = vmatpush1.bf16.msra.mxu0 %v2927_v15  ;;  %v3017_v15 = vld [vmem:[#allocation12 + $0xd0] ss:$8 sps:$4 sm:$0xff]  }
 0x13b   :  { %1575 = vmatpush1.bf16.msra.mxu1 %v2930_v16  ;;  %863 = vmatprep.subr.bf16.mxu0 %v2935_v17  ;;  %v3020_v16 = vld [vmem:[#allocation11 + $0xd0] ss:$8 sps:$4 sm:$0xff]   ;;  %v3025_v17 = vld [vmem:[#allocation12 + $0xe4] ss:$8 sps:$4 sm:$0xff]  }
 0x13c   :  { %1576 = vmatprep.subr.bf16.mxu1 %v2938_v18  ;;  %v3028_v18 = vld [vmem:[#allocation11 + $0xe4] ss:$8 sps:$4 sm:$0xff]  }
 0x13e   :  { %864 = vmatpush1.bf16.msra.mxu0 %v2933_v19  ;;  %v3023_v19 = vld [vmem:[#allocation12 + $0xe0] ss:$8 sps:$4 sm:$0xff]  }
 0x13f   :  { %1577 = vmatpush1.bf16.msra.mxu1 %v2936_v20  ;;  %1817 = vmatprep.subr.bf16.mxu0 %v2941_v23  ;;  %v3026_v20 = vld [vmem:[#allocation11 + $0xe0] ss:$8 sps:$4 sm:$0xff]   ;;  %v3029_v23 = vld [vmem:[#allocation12 + $0xf0] ss:$8 sps:$4 sm:$0xff]  }
 0x140   :  { %2018 = vmatprep.subr.bf16.mxu1 %v2944_v24  ;;  %v3032_v24 = vld [vmem:[#allocation11 + $0xf0] ss:$8 sps:$4 sm:$0xff]  }
 0x141   :  { %866 = vmatmul.mubr.bf16.vlgmr.msra.gmra.mrb[0].mxu0 %v149_v25  ;;  %v3035_v25 = vld [vmem:[#allocation14 + $0x40] sm:$0xff]  }
 0x142   :  { %1579 = vmatmul.mubr.bf16.vlgmr.msra.gmra.mrb[0].mxu1 %v161_v26  ;;  %1818 = vmatpush1.bf16.msra.mxu0 %v2939_v27  ;;  %v261_v26 = vlaneseq }
 0x143   :  { %2019 = vmatpush1.bf16.msra.mxu1 %v2942_v28  ;;  %1819 = vmatprep.subr.bf16.mxu0 %v2947_v29  ;;  %v259_v29 = vld [vmem:[%s3459_s3] sm:$0x3] }
 0x144   :  { %2020 = vmatprep.subr.bf16.mxu1 %v2950_v30  ;;  %v262_v27 = vshrl.u32 %v261_v26, 7  ;;  %v972_v30 = vld [vmem:[%s3461_s5] sm:$0x3] }
 0x145   :  { %v2253_v26 = vld [vmem:[%s3467_s11] sm:$0x1]  ;;  %s3248_s11 = smov [#allocation15]  }
 0x146   :  { %1820 = vmatpush1.bf16.msra.mxu0 %v2945_v31  ;;  %v3418_v28 = vsub.s32 0, %v262_v27  ;;  %v3426_v31 = vsub.s32 1, %v262_v27  ;;  %s2310_s23 = sshll.u32 %s3248_s11, 4  ;;  %s2311_s23 = int_to_ptr.vmem [resolvable:$true] %s2310_s23 }
 0x147   :  { %2021 = vmatpush1.bf16.msra.mxu1 %v2948_v32  ;;  %1821 = vmatprep.subr.bf16.mxu0 %v2953_v33  ;;  %s3209_s25 = scalar_lea.vmem %s2311_s23, 32  ;;  %p3210_p1 = scmp.lt.s32.totalorder %s2311_s23, %s2311_s23 }
 0x148   :  { %2022 = vmatprep.subr.bf16.mxu1 %v2956_v34  ;;  %v264_v32 = vrot.slane %v259_v29, %v3418_v28  ;;  %v977_v33 = vrot.slane %v972_v30, %v3418_v28  ;;  %v268_v34 = vrot.slane %v259_v29, %v3426_v31  ;;  %v2254_v29 = vunpack.c.l.bf16 %v2253_v26 }
 0x14a   :  { %1822 = vmatpush1.bf16.msra.mxu0 %v2951_v35  ;;  %v981_v35 = vrot.slane %v972_v30, %v3426_v31 }
 0x14b   :  { %2023 = vmatpush1.bf16.msra.mxu1 %v2954_v36  ;;  %1823 = vmatprep.subr.bf16.mxu0 %v2959_v37 }
 0x14c   :  { %2024 = vmatprep.subr.bf16.mxu1 %v2962_v38 }
 0x14e   :  { %1824 = vmatpush1.bf16.msra.mxu0 %v2957_v39 }
 0x14f   :  { %2025 = vmatpush1.bf16.msra.mxu1 %v2960_v40  ;;  %1825 = vmatprep.subr.bf16.mxu0 %v2965_v41 }
 0x150   :  { %2026 = vmatprep.subr.bf16.mxu1 %v2968_v42 }
 0x152   :  { %1826 = vmatpush1.bf16.msra.mxu0 %v2963_v43 }
 0x153   :  { %2027 = vmatpush1.bf16.msra.mxu1 %v2966_v44  ;;  %1827 = vmatprep.subr.bf16.mxu0 %v2971_v45 }
 0x154   :  { %2028 = vmatprep.subr.bf16.mxu1 %v2974_v46 }
 0x156   :  { %1828 = vmatpush1.bf16.msra.mxu0 %v2969_v47 }
 0x157   :  { %2029 = vmatpush1.bf16.msra.mxu1 %v2972_v48  ;;  %1829 = vmatprep.subr.bf16.mxu0 %v2977_v49 }
 0x158   :  { %2030 = vmatprep.subr.bf16.mxu1 %v2980_v50 }
 0x15a   :  { %1830 = vmatpush1.bf16.msra.mxu0 %v2975_v51 }
 0x15b   :  { %2031 = vmatpush1.bf16.msra.mxu1 %v2978_v52  ;;  %1831 = vmatprep.subr.bf16.mxu0 %v2983_v53 }
 0x15c   :  { %2032 = vmatprep.subr.bf16.mxu1 %v2986_v54  ;;  %v3036_v54 = vld [vmem:[#allocation14] sm:$0xff]  }
 0x15e   :  { %1832 = vmatpush1.bf16.msra.mxu0 %v2981_v55 }
 0x15f   :  { %2033 = vmatpush1.bf16.msra.mxu1 %v2984_v56  ;;  %1833 = vmatprep.subr.bf16.mxu0 %v2989_v57  ;;  %v3037_v57 = vld [vmem:[#allocation14 + $0x48] sm:$0xff]  }
 0x160   :  { %2034 = vmatprep.subr.bf16.mxu1 %v2992_v58  ;;  %v3038_v58 = vld [vmem:[#allocation14 + $0x8] sm:$0xff]  }
 0x162   :  { %1834 = vmatpush1.bf16.msra.mxu0 %v2987_v59  ;;  %v3039_v59 = vld [vmem:[#allocation14 + $0x50] sm:$0xff]  }
 0x163   :  { %2035 = vmatpush1.bf16.msra.mxu1 %v2990_v60  ;;  %1835 = vmatprep.subr.bf16.mxu0 %v2995_v61  ;;  %v3040_v60 = vld [vmem:[#allocation14 + $0x10] sm:$0xff]   ;;  %v3041_v61 = vld [vmem:[#allocation14 + $0x58] sm:$0xff]  }
 0x164   :  { %2036 = vmatprep.subr.bf16.mxu1 %v2998_v62  ;;  %v3042_v62 = vld [vmem:[#allocation14 + $0x18] sm:$0xff]  }
 0x166   :  { %1836 = vmatpush1.bf16.msra.mxu0 %v2993_v63  ;;  %v3043_v63 = vld [vmem:[#allocation14 + $0x60] sm:$0xff]  }
 0x167   :  { %2037 = vmatpush1.bf16.msra.mxu1 %v2996_v0  ;;  %1837 = vmatprep.subr.bf16.mxu0 %v3001_v1  ;;  %v3044_v0 = vld [vmem:[#allocation14 + $0x20] sm:$0xff]   ;;  %v3045_v1 = vld [vmem:[#allocation14 + $0x68] sm:$0xff]  }
 0x168   :  { %2038 = vmatprep.subr.bf16.mxu1 %v3004_v2  ;;  %v3046_v2 = vld [vmem:[#allocation14 + $0x28] sm:$0xff]  }
 0x16a   :  { %1838 = vmatpush1.bf16.msra.mxu0 %v2999_v3  ;;  %v3047_v3 = vld [vmem:[#allocation14 + $0x70] sm:$0xff]  }
 0x16b   :  { %2039 = vmatpush1.bf16.msra.mxu1 %v3002_v4  ;;  %1839 = vmatprep.subr.bf16.mxu0 %v3007_v5  ;;  %v3048_v4 = vld [vmem:[#allocation14 + $0x30] sm:$0xff]   ;;  %v3049_v5 = vld [vmem:[#allocation14 + $0x78] sm:$0xff]  }
 0x16c   :  { %2040 = vmatprep.subr.bf16.mxu1 %v3010_v6  ;;  %v3050_v6 = vld [vmem:[#allocation14 + $0x38] sm:$0xff]  }
 0x16e   :  { %1840 = vmatpush1.bf16.msra.mxu0 %v3005_v7  ;;  %v2059_v7 = vld [vmem:[%s3464_s8] sm:$0x3] }
 0x16f   :  { %2041 = vmatpush1.bf16.msra.mxu1 %v3008_v8  ;;  %1841 = vmatprep.subr.bf16.mxu0 %v3013_v9  ;;  %v2064_v8 = vrot.slane %v2059_v7, %v3418_v28 }
 0x170   :  { %2042 = vmatprep.subr.bf16.mxu1 %v3016_v10 }
 0x172   :  { %1842 = vmatpush1.bf16.msra.mxu0 %v3011_v11  ;;  %v2068_v11 = vrot.slane %v2059_v7, %v3426_v31  ;;  %v2578_v31 = vld [vmem:[%s3466_s10] ss:$0 sm:$0xff]  ;;  %s3205_s10 = scalar_lea.vmem %s2311_s23, 16 }
 0x173   :  { %2043 = vmatpush1.bf16.msra.mxu1 %v3014_v12  ;;  %1843 = vmatprep.subr.bf16.mxu0 %v3019_v13  ;;  %p3206_p0 = scmp.ne.s32.totalorder %s2311_s23, %s3205_s10  ;;  %p3211_p2 = scmp.lt.s32.totalorder %s3209_s25, %s3205_s10 }
 0x174   :  { %2044 = vmatprep.subr.bf16.mxu1 %v3022_v14 }
 0x175   :  { %p3212_p3 = por %p3211_p2, %p3210_p1 }
 0x176   :  { %1844 = vmatpush1.bf16.msra.mxu0 %v3017_v15 }
 0x177   :  { %2045 = vmatpush1.bf16.msra.mxu1 %v3020_v16  ;;  %1845 = vmatprep.subr.bf16.mxu0 %v3025_v17  ;;  %p3213_p4 = pnand %p3212_p3, %p3206_p0 }
 0x178   :  { %2046 = vmatprep.subr.bf16.mxu1 %v3028_v18 }
 0x17a   :  { %1846 = vmatpush1.bf16.msra.mxu0 %v3023_v19 }
 0x17b   :  { %2047 = vmatpush1.bf16.msra.mxu1 %v3026_v20  ;;  %1847 = vmatprep.subr.bf16.mxu0 %v3031_v21 }
 0x17c   :  { %2048 = vmatprep.subr.bf16.mxu1 %v3034_v22 }
 0x17e   :  { %1848 = vmatpush1.bf16.msra.mxu0 %v3029_v23 }
 0x17f   :  { %2049 = vmatpush1.bf16.msra.mxu1 %v3032_v24  ;;  %2596 = vmatprep.subr.bf16.mxu0 %v3035_v25 }
 0x214   :  { %v867_v36 = vpop.f32.mrb[0].mxu0 }
 0x215   :  { %v1580_v37 = vpop.f32.mrb[0].mxu1  ;;  %v2618_v38 = vadd.f32 %v867_v36, %v264_v32  ;;  %v869_v40 = vpop.f32.mrb[1].mxu0  ;;  %v2258_v36 = vrot.slane %v2254_v29, %v3418_v28 }
 0x216   :  { %v2620_v39 = vadd.f32 %v1580_v37, %v977_v33  ;;  %v1582_v41 = vpop.f32.mrb[1].mxu1  ;;  %v2619_v42 = vadd.f32 %v869_v40, %v268_v34  ;;  %v871_v44 = vpop.f32.mrb[2].mxu0 }
 0x217   :  { %v2621_v43 = vadd.f32 %v1582_v41, %v981_v35  ;;  %v1584_v45 = vpop.f32.mrb[2].mxu1  ;;  %v874_v46 = vmax.f32 %v2618_v38, 0.0  ;;  %v872_v48 = vpop.f32.mrb[3].mxu0 }
 0x218   :  { %v1587_v47 = vmax.f32 %v2620_v39, 0.0  ;;  %v1585_v49 = vpop.f32.mrb[3].mxu1  ;;  %v875_v50 = vmax.f32 %v2619_v42, 0.0  ;;  %v2595_v39 = vld [vmem:[#allocation2] ss:$0 sm:$0xff] }
 0x219   :  { %v1588_v51 = vmax.f32 %v2621_v43, 0.0  ;;  %v1589_v55 = vpack.c.bf16 %v874_v46, %v874_v46 }
 0x21a   :  { %v1590_v52 = vpack.c.bf16 %v875_v50, %v875_v50  ;;  %v1623_v56 = vpack.c.bf16 %v1587_v47, %v1587_v47 }
 0x21b   :  { %v1624_v53 = vpack.c.bf16 %v1588_v51, %v1588_v51 }
 0x21c   :  { %2050 = vmatprep.mubr.bf16.mxu1 %v1590_v52 }
 0x21d   :  { %1849 = vmatprep.mubr.bf16.mxu0 %v1624_v53  ;;  %2051 = vmatmul.mubr.bf16.vlgmr.msra.gmra.mrb[4].mxu1 %v1589_v55 }
 0x21e   :  { %1850 = vmatmul.mubr.bf16.vlgmr.msra.gmra.mrb[4].mxu0 %v1623_v56 }
 0x21f   :  { %2597 = vmatpush3.bf16.msra.mxu0 %v3036_v54 }
 0x220   :  { %2598 = vmatprep.subr.bf16.mxu0 %v3037_v57 }
 0x223   :  { %2599 = vmatpush3.bf16.msra.mxu0 %v3038_v58 }
 0x224   :  { %2600 = vmatprep.subr.bf16.mxu0 %v3039_v59 }
 0x227   :  { %2601 = vmatpush3.bf16.msra.mxu0 %v3040_v60 }
 0x228   :  { %2602 = vmatprep.subr.bf16.mxu0 %v3041_v61 }
 0x22b   :  { %2603 = vmatpush3.bf16.msra.mxu0 %v3042_v62 }
 0x22c   :  { %2604 = vmatprep.subr.bf16.mxu0 %v3043_v63 }
 0x22f   :  { %2605 = vmatpush3.bf16.msra.mxu0 %v3044_v0 }
 0x230   :  { %2606 = vmatprep.subr.bf16.mxu0 %v3045_v1 }
 0x233   :  { %2607 = vmatpush3.bf16.msra.mxu0 %v3046_v2 }
 0x234   :  { %2608 = vmatprep.subr.bf16.mxu0 %v3047_v3 }
 0x237   :  { %2609 = vmatpush3.bf16.msra.mxu0 %v3048_v4 }
 0x238   :  { %2610 = vmatprep.subr.bf16.mxu0 %v3049_v5 }
 0x23b   :  { %2611 = vmatpush3.bf16.msra.mxu0 %v3050_v6 }
 0x2f0   :  { %v2052_v10 = vpop.f32.mrb[4].mxu1 }
 0x2f1   :  { %v1851_v9 = vpop.f32.mrb[4].mxu0  ;;  %v2054_v14 = vpop.f32.mrb[5].mxu1 }
 0x2f2   :  { %v2053_v12 = vadd.f32 %v2052_v10, %v1851_v9  ;;  %v1853_v13 = vpop.f32.mrb[5].mxu0  ;;  %v2056_v17 = vpop.f32.mrb[6].mxu1 }
 0x2f3   :  { %v2055_v15 = vadd.f32 %v2054_v14, %v1853_v13  ;;  %v1855_v16 = vpop.f32.mrb[6].mxu0  ;;  %v2057_v20 = vpop.f32.mrb[7].mxu1 }
 0x2f4   :  { %v2071_v18 = vadd.f32 %v2064_v8, %v2053_v12  ;;  %v1856_v19 = vpop.f32.mrb[7].mxu0 }
 0x2f5   :  { %v2072_v21 = vadd.f32 %v2068_v11, %v2055_v15 }
 0x2f6   :  { %v2073_v22 = vmax.f32 %v2071_v18, 0.0 }
 0x2f7   :  { %v2074_v23 = vmax.f32 %v2072_v21, 0.0 }
 0x2f8   :  { %v2075_v25 = vpack.c.bf16 %v2073_v22, %v2073_v22 }
 0x2f9   :  { %v2076_v24 = vpack.c.bf16 %v2074_v23, %v2074_v23 }
 0x2fb   :  { %2244 = vmatprep.mubr.bf16.mxu0 %v2076_v24 }
 0x2fc   :  { %2245 = vmatmul.mubr.bf16.vlgmr.msra.gmra.mrb[8].mxu0 %v2075_v25 }
 0x3cf   :  { %v2612_v27 = vpop.f32.mrb[8].mxu0 }
 0x3d0   :  { %v2613_v30 = vpop.f32.mrb[9].mxu0 }
 0x3d1   :  { %v2614_v32 = vadd.f32 %v2613_v30, %v2612_v27  ;;  %v2615_v33 = vpop.f32.mrb[10].mxu0 }
 0x3d2   :  { %v2616_v34 = vpop.f32.mrb[11].mxu0 }
 0x3d3   :  { %v2247_v35 = vadd.f32 %v2614_v32, %v2578_v31 }
 0x3d5   :  { %v2252_v37 = vmax.f32 %v2247_v35, 0.0 }
 0x3d7   :  { %v2259_v38 = vmul.f32 %v2258_v36, %v2252_v37 }
 0x3d9   :  { %2260 = vadd.xlane.f32.xlu0 %v2259_v38 }
 0x466   :  { %v2261_v40 = vpop.xlane.xlu0 %2260 }
 0x467   :  { %v2269_v41 = vadd.f32 %v2595_v39, %v2261_v40 }
 0x469   :  { %2270 = vxpose.xlu0.b32.start.end [1/1] (short) (narrow) %v2269_v41, 8 }
 0x4e9   :  { %v2286_v42 = vpop.trf.xlu0 }
 0x4ea   :  { %2303 = vst.msk [vmem:[#allocation15] sm:$0x1] %vm2302_vm0, %v2286_v42 }
 0x4eb   :  { %3216 = shalt.err (!%p3213_p4)
}
 0x4ec   :  { %s3217_s15 = scalar_lea.hbm %s3469_s13, 16 }
 0x4ed   :  { %p3218_p5 = scmp.ne.s32.totalorder %s3469_s13, %s3217_s15  ;;  %p3221_p6 = scmp.lt.u32.totalorder %s3217_s15, %s3469_s13 }
 0x4ef   :  { %p3223_p7 = pnand %p3221_p6, %p3218_p5 }
 0x4f1   :  { %3226 = shalt.err (!%p3223_p7)
}
 0x4f2   :  { %2313 = dma.vmem_to_hbm [thread:$0]  %s2311_s23, 16, %s3469_s13, [#allocation5]  }
 0x4f3   :  { %3235 = dma.done.wait [#allocation5], 16  }
 0x4f4   :  { %3236 = vsyncadd [#allocation5], 4294967280 }
 0x4f5   :  { %2317 = vsyncpa [#allocation4], 1 }
 0x4f6   :  { %2318 = vsyncpa [#allocation7], 1 }
 0x4f7   :  { %2319 = vsyncpa [#allocation10], 1 }
 0x4f8   :  { %2320 = vsyncpa [#allocation13], 1 }
 0x4f9   :  { %2321 = vsyncpa [#allocation5], 1 }

</bundles_post_ra>
